<compile_context>
chip_gen: v6e
topology: v6e:2x2x1
jax: 0.10.0
libtpu: 0.0.40
codegen_flags: <defaults>
</compile_context>

<pallas_src>
import functools

import jax
import jax.numpy as jnp
from jax.experimental import pallas as pl
from jax.experimental.pallas import tpu as pltpu

_HIGHEST = jax.lax.Precision.HIGHEST


# ----------------------------- fused Pallas kernel ----------------------------- #
def _fused_forward_kernel(x_ref, wr_ref, br_ref, *rest, n_levels):
    """Entire PPGActorCritic forward for one batch tile, fully VMEM-resident.

    rest = (w_0, b_0, ..., w_{n_levels-1}, b_{n_levels-1}, o_ref)
    """
    o_ref = rest[-1]
    # HBM storage may be bf16; all in-kernel VPU math stays f32 (v5e-safe).
    x = x_ref[...].astype(jnp.float32)

    # Fused policy+critic representation: one (obs_dim, 2*state_dim) MXU matmul + ReLU.
    h = jnp.dot(x, wr_ref[...], preferred_element_type=jnp.float32,
                precision=_HIGHEST) + br_ref[...]
    h = jnp.maximum(h, 0.0)                 # (TB, 2*state) = [policy_state | critic_state]

    # Fused actor/critic/aux heads: block-diagonal matmuls.  An identity block
    # carries policy_state through every level, so the last matmul already
    # produces the lane-dense output slab [policy_state | logits | v | aux_v | pad]
    # and the store needs no concatenate.  The carried policy_state is >= 0, so
    # the hidden-level ReLUs are no-ops on it.
    for lvl in range(n_levels):
        w = rest[2 * lvl][...]
        b = rest[2 * lvl + 1][...]
        h = jnp.dot(h, w, preferred_element_type=jnp.float32,
                    precision=_HIGHEST) + b
        if lvl < n_levels - 1:
            h = jnp.maximum(h, 0.0)

    o_ref[...] = h.astype(o_ref.dtype)


# --------------------------- parameter helpers ----------------------------- #
def _init_linear(key, fan_in, fan_out):
    # Deterministic init mimicking torch.nn.Linear default (uniform +/- 1/sqrt(fan_in)).
    kw, kb = jax.random.split(key)
    bound = 1.0 / jnp.sqrt(jnp.asarray(fan_in, jnp.float32))
    w = jax.random.uniform(kw, (fan_in, fan_out), jnp.float32, -bound, bound)
    b = jax.random.uniform(kb, (fan_out,), jnp.float32, -bound, bound)
    return {"w": w, "b": b}


def _init_mlp(key, sizes):
    keys = jax.random.split(key, len(sizes) - 1)
    return [_init_linear(k, sizes[i], sizes[i + 1]) for i, k in enumerate(keys)]


def init_ppg_actor_critic(key, obs_dim, state_dim, action_dim,
                          actor_hidden, critic_hidden):
    k_repr, k_actor, k_critic, k_aux = jax.random.split(key, 4)
    repr_params = _init_mlp(k_repr, [obs_dim, state_dim])  # Basic_MLP: obs -> state, ReLU
    return {
        # critic_representation = copy.deepcopy(representation) => identical at init,
        # but kept as separate parameters (they diverge during training).
        "policy_representation": repr_params,
        "critic_representation": jax.tree_util.tree_map(lambda a: a, repr_params),
        "actor": _init_mlp(k_actor, [state_dim] + list(actor_hidden) + [action_dim]),
        "critic": _init_mlp(k_critic, [state_dim] + list(critic_hidden) + [1]),
        "aux_critic": _init_mlp(k_aux, [state_dim] + list(critic_hidden) + [1]),
    }


def pack_ppg_params(params, *, state_dim, action_dim):
    """Pre-pack weights.  Call ONCE (outside the per-step jitted forward).

    Concatenates the two representations, block-diagonalizes the three heads and
    inserts an identity block that carries policy_state through every head level.
    """
    f32 = jnp.float32
    wr = jnp.concatenate([params["policy_representation"][0]["w"],
                          params["critic_representation"][0]["w"]],
                         axis=1).astype(f32)                                  # (obs, 2*state)
    br = jnp.concatenate([params["policy_representation"][0]["b"],
                          params["critic_representation"][0]["b"]])[None, :].astype(f32)

    actor, critic, aux = params["actor"], params["critic"], params["aux_critic"]
    n_levels = len(actor)
    assert len(critic) == n_levels == len(aux), "fused kernel assumes equal head depth"

    # Output slab: [policy_state | logits | v | aux_v | pad].  critic_state is NOT a
    # module output, so it is never written to HBM (dead-lane write traffic removed).
    need = state_dim + action_dim + 2
    slab = 64 if need <= 64 else pl.cdiv(need, 128) * 128

    eye = jnp.eye(state_dim, dtype=f32)
    levels = []
    for lvl in range(n_levels):
        wa, ba = actor[lvl]["w"].astype(f32), actor[lvl]["b"].astype(f32)
        wc, bc = critic[lvl]["w"].astype(f32), critic[lvl]["b"].astype(f32)
        wx, bx = aux[lvl]["w"].astype(f32), aux[lvl]["b"].astype(f32)
        if lvl == 0:
            # Input is [policy_state | critic_state]; actor & aux read policy_state,
            # critic reads critic_state; identity carries policy_state forward.
            row_p = jnp.concatenate(
                [eye, wa, jnp.zeros((state_dim, wc.shape[1]), f32), wx], axis=1)
            row_c = jnp.concatenate(
                [jnp.zeros((state_dim, state_dim + wa.shape[1]), f32), wc,
                 jnp.zeros((state_dim, wx.shape[1]), f32)], axis=1)
            w = jnp.concatenate([row_p, row_c], axis=0)
        else:
            w = jax.scipy.linalg.block_diag(eye, wa, wc, wx)
        b = jnp.concatenate([jnp.zeros((state_dim,), f32), ba, bc, bx])[None, :]
        if lvl == n_levels - 1:
            pad = slab - w.shape[1]
            w = jnp.pad(w, ((0, 0), (0, pad)))
            b = jnp.pad(b, ((0, 0), (0, pad)))
        levels.append((w, b))
    return {"wr": wr, "br": br, "levels": levels}


# ------------------------------- forward ----------------------------------- #
_SUB = 16            # batch-row granularity (bf16-safe sublane packing)
_TARGET_TILE = 1024  # large-batch streaming tile (per-step overhead amortized)


def _choose_tiling(batch):
    b = pl.cdiv(batch, _SUB) * _SUB
    if b <= 2 * _SUB:
        n_tiles = 1                       # tiny batch: a single launch is cheapest
    else:
        # >= 2 tiles so both v7x TensorCores get work; ~1024-row tiles at large
        # batch so the ~0.35us per-grid-step overhead amortizes.  tile_b derived
        # from ceil(b / n_tiles) keeps padding waste bounded by 16*n_tiles rows.
        n_tiles = max(2, pl.cdiv(b, _TARGET_TILE))
    tile_b = pl.cdiv(pl.cdiv(b, n_tiles), _SUB) * _SUB
    return tile_b, n_tiles


def ppg_actor_critic_forward(packed, observation, *, state_dim, action_dim,
                             io_dtype=jnp.bfloat16):
    """Fused forward.  `packed` must come from pack_ppg_params (packed once)."""
    B, obs_dim = observation.shape
    wr, br, levels = packed["wr"], packed["br"], packed["levels"]
    n_levels = len(levels)
    slab = levels[-1][0].shape[1]

    tile_b, n_tiles = _choose_tiling(B)
    b_pad = tile_b * n_tiles
    # bf16 HBM storage halves the only traffic that scales with B (obs read, slab
    # write); in-kernel math stays f32.
    x = jnp.pad(observation, ((0, b_pad - B), (0, 0))).astype(io_dtype)

    const = lambda i: (0, 0)            # weights/biases: resident across the whole grid
    in_arrays = [x, wr, br]
    in_specs = [pl.BlockSpec((tile_b, obs_dim), lambda i: (i, 0)),
                pl.BlockSpec(wr.shape, const),
                pl.BlockSpec(br.shape, const)]
    for w, b in levels:
        in_arrays += [w, b]
        in_specs += [pl.BlockSpec(w.shape, const), pl.BlockSpec(b.shape, const)]

    out = pl.pallas_call(
        functools.partial(_fused_forward_kernel, n_levels=n_levels),
        out_shape=jax.ShapeDtypeStruct((b_pad, slab), io_dtype),
        grid=(n_tiles,),
        in_specs=in_specs,
        # TODO(synk): if profiling at very large batch still shows exposed DMA,
        # add pipeline_mode=pl.Buffered(3) to the x in_spec and this out_spec.
        out_specs=pl.BlockSpec((tile_b, slab), lambda i: (i, 0)),
        compiler_params=pltpu.CompilerParams(
            dimension_semantics=("parallel",)),   # shard batch tiles across v7x's 2 TCs
    )(*in_arrays)

    out = out.astype(jnp.float32)
    policy_state = out[:B, :state_dim]
    logits = out[:B, state_dim:state_dim + action_dim]
    v = out[:B, state_dim + action_dim]
    aux_v = out[:B, state_dim + action_dim + 1]
    return {"state": policy_state}, logits, v, aux_v


# --------------------------- pure-JAX reference ----------------------------- #
def _reference_forward(params, observation):
    def mlp(layers, x, final_act=False):
        n = len(layers)
        for i, p in enumerate(layers):
            x = jnp.dot(x, p["w"], precision=_HIGHEST) + p["b"]
            if i < n - 1 or final_act:
                x = jnp.maximum(x, 0.0)
        return x

    p_state = mlp(params["policy_representation"], observation, final_act=True)
    c_state = mlp(params["critic_representation"], observation, final_act=True)
    logits = mlp(params["actor"], p_state)
    v = mlp(params["critic"], c_state)[:, 0]
    aux_v = mlp(params["aux_critic"], p_state)[:, 0]
    return p_state, logits, v, aux_v


# --------------------------------- main ------------------------------------ #
if __name__ == "__main__":
    key = jax.random.PRNGKey(0)
    k_params, k_obs = jax.random.split(key)

    obs_dim = 16
    state_dim = 32
    action_dim = 4
    actor_hidden = [32, 32]
    critic_hidden = [32, 32]

    params = init_ppg_actor_critic(k_params, obs_dim, state_dim, action_dim,
                                   actor_hidden, critic_hidden)
    # Pack ONCE, outside the per-call forward (no per-step XLA re-pack prologue).
    packed = pack_ppg_params(params, state_dim=state_dim, action_dim=action_dim)

    fwd_f32 = jax.jit(functools.partial(ppg_actor_critic_forward,
                                        state_dim=state_dim, action_dim=action_dim,
                                        io_dtype=jnp.float32))
    fwd_bf16 = jax.jit(functools.partial(ppg_actor_critic_forward,
                                         state_dim=state_dim, action_dim=action_dim,
                                         io_dtype=jnp.bfloat16))

    # ---- primary check: batch=2, single tile, f32 I/O, tight tolerance ----
    batch = 2
    observation = jax.random.normal(k_obs, (batch, obs_dim), jnp.float32)
    policy_outputs, a_logits, v, aux_v = fwd_f32(packed, observation)
    jax.block_until_ready((policy_outputs["state"], a_logits, v, aux_v))

    # Shape checks (match PyTorch module outputs).
    assert policy_outputs["state"].shape == (batch, state_dim)
    assert a_logits.shape == (batch, action_dim)
    assert v.shape == (batch,)
    assert aux_v.shape == (batch,)

    ref_ps, ref_logits, ref_v, ref_aux = _reference_forward(params, observation)
    assert jnp.allclose(policy_outputs["state"], ref_ps, rtol=1e-4, atol=1e-4)
    assert jnp.allclose(a_logits, ref_logits, rtol=1e-4, atol=1e-4)
    assert jnp.allclose(v, ref_v, rtol=1e-4, atol=1e-4)
    assert jnp.allclose(aux_v, ref_aux, rtol=1e-4, atol=1e-4)

    # ---- secondary check: batch=50 -> 2 parallel tiles + batch padding,
    # bf16 HBM I/O (tolerance reflects bf16 storage rounding only) ----
    obs2 = jax.random.normal(jax.random.PRNGKey(1), (50, obs_dim), jnp.float32)
    po2, lg2, v2, ax2 = fwd_bf16(packed, obs2)
    jax.block_until_ready((po2["state"], lg2, v2, ax2))
    rps2, rlg2, rv2, rax2 = _reference_forward(params, obs2)
    assert po2["state"].shape == (50, state_dim) and lg2.shape == (50, action_dim)
    assert v2.shape == (50,) and ax2.shape == (50,)
    assert jnp.allclose(po2["state"], rps2, rtol=5e-2, atol=5e-2)
    assert jnp.allclose(lg2, rlg2, rtol=5e-2, atol=5e-2)
    assert jnp.allclose(v2, rv2, rtol=5e-2, atol=5e-2)
    assert jnp.allclose(ax2, rax2, rtol=5e-2, atol=5e-2)

    print("KERNEL_OK")
</pallas_src>

<mosaic_0001>
module attributes {stable_mosaic.version = 11 : i64} {
  func.func @_fused_forward_kernel(%arg0: i32, %arg1: memref<16x16xf32, #tpu.memory_space<vmem>>, %arg2: memref<16x64xf32, #tpu.memory_space<vmem>>, %arg3: memref<1x64xf32, #tpu.memory_space<vmem>>, %arg4: memref<64x128xf32, #tpu.memory_space<vmem>>, %arg5: memref<1x128xf32, #tpu.memory_space<vmem>>, %arg6: memref<128x128xf32, #tpu.memory_space<vmem>>, %arg7: memref<1x128xf32, #tpu.memory_space<vmem>>, %arg8: memref<128x64xf32, #tpu.memory_space<vmem>>, %arg9: memref<1x64xf32, #tpu.memory_space<vmem>>, %arg10: memref<16x64xf32, #tpu.memory_space<vmem>>) attributes {dimension_semantics = [#tpu.dimension_semantics<parallel>], iteration_bounds = array<i64: 1>, scalar_prefetch = 0 : i64, scratch_operands = 0 : i64, tpu.core_type = #tpu.core_type<tc>, window_params = [{transform_indices = @transform_0, window_bounds = array<i64: 16, 16>}, {pipeline_mode = #tpu.pipeline_mode<synchronous>, transform_indices = @transform_1, window_bounds = array<i64: 16, 64>}, {pipeline_mode = #tpu.pipeline_mode<synchronous>, transform_indices = @transform_2, window_bounds = array<i64: 1, 64>}, {pipeline_mode = #tpu.pipeline_mode<synchronous>, transform_indices = @transform_3, window_bounds = array<i64: 64, 128>}, {pipeline_mode = #tpu.pipeline_mode<synchronous>, transform_indices = @transform_4, window_bounds = array<i64: 1, 128>}, {pipeline_mode = #tpu.pipeline_mode<synchronous>, transform_indices = @transform_5, window_bounds = array<i64: 128, 128>}, {pipeline_mode = #tpu.pipeline_mode<synchronous>, transform_indices = @transform_6, window_bounds = array<i64: 1, 128>}, {pipeline_mode = #tpu.pipeline_mode<synchronous>, transform_indices = @transform_7, window_bounds = array<i64: 128, 64>}, {pipeline_mode = #tpu.pipeline_mode<synchronous>, transform_indices = @transform_8, window_bounds = array<i64: 1, 64>}, {transform_indices = @transform_9, window_bounds = array<i64: 16, 64>}]} {
    %c0 = arith.constant 0 : index
    %c0_0 = arith.constant 0 : index
    %0 = vector.load %arg1[%c0, %c0_0] : memref<16x16xf32, #tpu.memory_space<vmem>>, vector<16x16xf32>
    %c0_1 = arith.constant 0 : index
    %c0_2 = arith.constant 0 : index
    %1 = vector.load %arg2[%c0_1, %c0_2] : memref<16x64xf32, #tpu.memory_space<vmem>>, vector<16x64xf32>
    %cst = arith.constant dense<0.000000e+00> : vector<16x64xf32>
    %2 = tpu.matmul %0, %1, %cst {dimension_numbers = #tpu.dot_dimension_numbers<[1], [0], [0], [1], [0, 0, 1, 1], [], []>, precision = #tpu.contract_precision<fp32>} : vector<16x16xf32>, vector<16x64xf32>, vector<16x64xf32> -> vector<16x64xf32>
    %c0_3 = arith.constant 0 : index
    %c0_4 = arith.constant 0 : index
    %3 = vector.load %arg3[%c0_3, %c0_4] : memref<1x64xf32, #tpu.memory_space<vmem>>, vector<1x64xf32>
    %4 = vector.broadcast %3 : vector<1x64xf32> to vector<16x64xf32>
    %5 = arith.addf %2, %4 : vector<16x64xf32>
    %cst_5 = arith.constant 0.000000e+00 : f32
    %6 = vector.broadcast %cst_5 : f32 to vector<16x64xf32>
    %7 = arith.maximumf %5, %6 : vector<16x64xf32>
    %c0_6 = arith.constant 0 : index
    %c0_7 = arith.constant 0 : index
    %8 = vector.load %arg4[%c0_6, %c0_7] : memref<64x128xf32, #tpu.memory_space<vmem>>, vector<64x128xf32>
    %c0_8 = arith.constant 0 : index
    %c0_9 = arith.constant 0 : index
    %9 = vector.load %arg5[%c0_8, %c0_9] : memref<1x128xf32, #tpu.memory_space<vmem>>, vector<1x128xf32>
    %cst_10 = arith.constant dense<0.000000e+00> : vector<16x128xf32>
    %10 = tpu.matmul %7, %8, %cst_10 {dimension_numbers = #tpu.dot_dimension_numbers<[1], [0], [0], [1], [0, 0, 1, 1], [], []>, precision = #tpu.contract_precision<fp32>} : vector<16x64xf32>, vector<64x128xf32>, vector<16x128xf32> -> vector<16x128xf32>
    %11 = vector.broadcast %9 : vector<1x128xf32> to vector<16x128xf32>
    %12 = arith.addf %10, %11 : vector<16x128xf32>
    %cst_11 = arith.constant 0.000000e+00 : f32
    %13 = vector.broadcast %cst_11 : f32 to vector<16x128xf32>
    %14 = arith.maximumf %12, %13 : vector<16x128xf32>
    %c0_12 = arith.constant 0 : index
    %c0_13 = arith.constant 0 : index
    %15 = vector.load %arg6[%c0_12, %c0_13] : memref<128x128xf32, #tpu.memory_space<vmem>>, vector<128x128xf32>
    %c0_14 = arith.constant 0 : index
    %c0_15 = arith.constant 0 : index
    %16 = vector.load %arg7[%c0_14, %c0_15] : memref<1x128xf32, #tpu.memory_space<vmem>>, vector<1x128xf32>
    %cst_16 = arith.constant dense<0.000000e+00> : vector<16x128xf32>
    %17 = tpu.matmul %14, %15, %cst_16 {dimension_numbers = #tpu.dot_dimension_numbers<[1], [0], [0], [1], [0, 0, 1, 1], [], []>, precision = #tpu.contract_precision<fp32>} : vector<16x128xf32>, vector<128x128xf32>, vector<16x128xf32> -> vector<16x128xf32>
    %18 = vector.broadcast %16 : vector<1x128xf32> to vector<16x128xf32>
    %19 = arith.addf %17, %18 : vector<16x128xf32>
    %cst_17 = arith.constant 0.000000e+00 : f32
    %20 = vector.broadcast %cst_17 : f32 to vector<16x128xf32>
    %21 = arith.maximumf %19, %20 : vector<16x128xf32>
    %c0_18 = arith.constant 0 : index
    %c0_19 = arith.constant 0 : index
    %22 = vector.load %arg8[%c0_18, %c0_19] : memref<128x64xf32, #tpu.memory_space<vmem>>, vector<128x64xf32>
    %c0_20 = arith.constant 0 : index
    %c0_21 = arith.constant 0 : index
    %23 = vector.load %arg9[%c0_20, %c0_21] : memref<1x64xf32, #tpu.memory_space<vmem>>, vector<1x64xf32>
    %cst_22 = arith.constant dense<0.000000e+00> : vector<16x64xf32>
    %24 = tpu.matmul %21, %22, %cst_22 {dimension_numbers = #tpu.dot_dimension_numbers<[1], [0], [0], [1], [0, 0, 1, 1], [], []>, precision = #tpu.contract_precision<fp32>} : vector<16x128xf32>, vector<128x64xf32>, vector<16x64xf32> -> vector<16x64xf32>
    %25 = vector.broadcast %23 : vector<1x64xf32> to vector<16x64xf32>
    %26 = arith.addf %24, %25 : vector<16x64xf32>
    %c0_23 = arith.constant 0 : index
    %c0_24 = arith.constant 0 : index
    %27 = vector.load %arg10[%c0_23, %c0_24] : memref<16x64xf32, #tpu.memory_space<vmem>>, vector<16x64xf32>
    tpu.vector_store %arg10[%c0_23, %c0_24], %26 {strides = array<i32>} : memref<16x64xf32, #tpu.memory_space<vmem>>, vector<16x64xf32>,
    return
  }
  func.func @transform_0(%arg0: i32) -> (i32, i32) {
    %c0_i32 = arith.constant 0 : i32
    %c0_i32_0 = arith.constant 0 : i32
    return %arg0, %c0_i32 : i32, i32
  }
  func.func @transform_1(%arg0: i32) -> (i32, i32) {
    %c0_i32 = arith.constant 0 : i32
    %c0_i32_0 = arith.constant 0 : i32
    %c0_i32_1 = arith.constant 0 : i32
    return %c0_i32, %c0_i32_0 : i32, i32
  }
  func.func @transform_2(%arg0: i32) -> (i32, i32) {
    %c0_i32 = arith.constant 0 : i32
    %c0_i32_0 = arith.constant 0 : i32
    %c0_i32_1 = arith.constant 0 : i32
    return %c0_i32, %c0_i32_0 : i32, i32
  }
  func.func @transform_3(%arg0: i32) -> (i32, i32) {
    %c0_i32 = arith.constant 0 : i32
    %c0_i32_0 = arith.constant 0 : i32
    %c0_i32_1 = arith.constant 0 : i32
    return %c0_i32, %c0_i32_0 : i32, i32
  }
  func.func @transform_4(%arg0: i32) -> (i32, i32) {
    %c0_i32 = arith.constant 0 : i32
    %c0_i32_0 = arith.constant 0 : i32
    %c0_i32_1 = arith.constant 0 : i32
    return %c0_i32, %c0_i32_0 : i32, i32
  }
  func.func @transform_5(%arg0: i32) -> (i32, i32) {
    %c0_i32 = arith.constant 0 : i32
    %c0_i32_0 = arith.constant 0 : i32
    %c0_i32_1 = arith.constant 0 : i32
    return %c0_i32, %c0_i32_0 : i32, i32
  }
  func.func @transform_6(%arg0: i32) -> (i32, i32) {
    %c0_i32 = arith.constant 0 : i32
    %c0_i32_0 = arith.constant 0 : i32
    %c0_i32_1 = arith.constant 0 : i32
    return %c0_i32, %c0_i32_0 : i32, i32
  }
  func.func @transform_7(%arg0: i32) -> (i32, i32) {
    %c0_i32 = arith.constant 0 : i32
    %c0_i32_0 = arith.constant 0 : i32
    %c0_i32_1 = arith.constant 0 : i32
    return %c0_i32, %c0_i32_0 : i32, i32
  }
  func.func @transform_8(%arg0: i32) -> (i32, i32) {
    %c0_i32 = arith.constant 0 : i32
    %c0_i32_0 = arith.constant 0 : i32
    %c0_i32_1 = arith.constant 0 : i32
    return %c0_i32, %c0_i32_0 : i32, i32
  }
  func.func @transform_9(%arg0: i32) -> (i32, i32) {
    %c0_i32 = arith.constant 0 : i32
    %c0_i32_0 = arith.constant 0 : i32
    return %arg0, %c0_i32 : i32, i32
  }
}

</mosaic_0001>

<bundles_post_ra>
// kernel: ppg_actor_critic_forward.1
= control target key start
LH: loop header
LB: loop body
LE: loop exit
PB: predicated region body
PF: predicated region fallthrough
CT: control target
= control target key end

     0   :  { %vm43_vm0 = vcmask 130048   ;;  %vm569_vm1 = vcmask 523264   ;;  %s4512_s1 = inlined_call_operand.vmem [shape: f32[16,64], index: 1, kind: input, shape index: {}]   ;;  %s4513_s0 = inlined_call_operand.vmem [shape: f32[16,16], index: 0, kind: input, shape index: {}]   ;;  %s4514_s3 = inlined_call_operand.vmem [shape: f32[64,128], index: 3, kind: input, shape index: {}]   ;;  %s4515_s2 = inlined_call_operand.vmem [shape: f32[1,64], index: 2, kind: input, shape index: {}]   ;;  %s4516_s5 = inlined_call_operand.vmem [shape: f32[128,128], index: 5, kind: input, shape index: {}]   ;;  %s4517_s4 = inlined_call_operand.vmem [shape: f32[1,128], index: 4, kind: input, shape index: {}]   ;;  %s4518_s7 = inlined_call_operand.vmem [shape: f32[128,64], index: 7, kind: input, shape index: {}]   ;;  %s4519_s6 = inlined_call_operand.vmem [shape: f32[1,128], index: 6, kind: input, shape index: {}]   ;;  %s4520_s8 = inlined_call_operand.vmem [shape: f32[1,64], index: 8, kind: input, shape index: {}]   ;;  %s4521_s9 = inlined_call_operand.vmem [shape: f32[16,64], index: 9, kind: output, shape index: {}]  }
   0x1   :  { %v35_v0 = vld [vmem:[%s4512_s1 + $0x8] sm:$0xff]  ;;  %v34_v1 = vld [vmem:[%s4512_s1] sm:$0xff]  ;;  %v561_v26 = vld [vmem:[%s4514_s3 + $0x38] sm:$0xff] }
   0x2   :  { %v32_v2 = vld [vmem:[%s4513_s0] sm:$0xff]  ;;  %v79_v3 = vand.u32 4294901760, %v35_v0  ;;  %v82_v4 = vand.u32 4294901760, %v34_v1  ;;  %v33_v5 = vld [vmem:[%s4513_s0 + $0x8] sm:$0xff]  ;;  %v3525_v27 = vand.u32 4294901760, %v561_v26  ;;  %v560_v28 = vld [vmem:[%s4514_s3 + $0x30] sm:$0xff] }
   0x3   :  { %v45_v6 = vsel %vm43_vm0, %v32_v2, 0  ;;  %v48_v7 = vsel %vm43_vm0, %v33_v5, 0  ;;  %v3533_v30 = vand.u32 4294901760, %v560_v28  ;;  %v559_v31 = vld [vmem:[%s4514_s3 + $0x28] sm:$0xff]  ;;  %v558_v35 = vld [vmem:[%s4514_s3 + $0x20] sm:$0xff]  ;;  %v557_v40 = vld [vmem:[%s4514_s3 + $0x18] sm:$0xff] }
   0x4   :  { %v117_v8 = vand.u32 4294901760, %v45_v6  ;;  %2884 = vmatprep.subr.mxu0 %v79_v3  ;;  %v167_v9 = vsub.f32 %v35_v0, %v79_v3  ;;  %v127_v10 = vand.u32 4294901760, %v48_v7  ;;  %v174_v11 = vsub.f32 %v34_v1, %v82_v4  ;;  %v556_v46 = vld [vmem:[%s4514_s3 + $0x10] sm:$0xff]  ;;  %v555_v52 = vld [vmem:[%s4514_s3 + $0x8] sm:$0xff]  ;;  %v554_v58 = vld [vmem:[%s4514_s3] sm:$0xff] }
   0x5   :  { %2885 = vmatpush3.msra.mxu0 %v79_v3  ;;  %v3531_v29 = vsub.f32 %v561_v26, %v3525_v27  ;;  %v3544_v33 = vsub.f32 %v560_v28, %v3533_v30  ;;  %v3546_v34 = vand.u32 4294901760, %v559_v31  ;;  %v3561_v39 = vand.u32 4294901760, %v558_v35 }
   0x6   :  { %v118_v12 = vsub.f32 %v45_v6, %v117_v8  ;;  %2895 = vmatprep.mubr.f32.mxu1 %v117_v8  ;;  %2886 = vmatprep.subr.mxu0 %v82_v4  ;;  %v168_v13 = vand.u32 4294901760, %v167_v9  ;;  %v128_v14 = vsub.f32 %v48_v7, %v127_v10  ;;  %v175_v15 = vand.u32 4294901760, %v174_v11 }
   0x7   :  { %2887 = vmatpush3.msra.mxu0 %v82_v4  ;;  %v3541_v32 = vand.u32 4294901760, %v3531_v29  ;;  %v3556_v37 = vand.u32 4294901760, %v3544_v33  ;;  %v3559_v38 = vsub.f32 %v559_v31, %v3546_v34  ;;  %v3574_v44 = vsub.f32 %v558_v35, %v3561_v39 }
   0x8   :  { %v119_v16 = vand.u32 4294901760, %v118_v12  ;;  %v169_v17 = vsub.f32 %v167_v9, %v168_v13  ;;  %v129_v18 = vand.u32 4294901760, %v128_v14  ;;  %v176_v19 = vsub.f32 %v174_v11, %v175_v15  ;;  %2898 = vmatprep.subr.mxu0 %v167_v9 }
   0x9   :  { %v689_v36 = vsub.f32 %v3531_v29, %v3541_v32  ;;  %v696_v42 = vsub.f32 %v3544_v33, %v3556_v37  ;;  %v3571_v43 = vand.u32 4294901760, %v3559_v38  ;;  %v3577_v45 = vand.u32 4294901760, %v557_v40 }
   0xa   :  { %v120_v20 = vsub.f32 %v118_v12, %v119_v16  ;;  %v170_v21 = vand.u32 4294901760, %v169_v17  ;;  %v130_v22 = vsub.f32 %v128_v14, %v129_v18  ;;  %v177_v23 = vand.u32 4294901760, %v176_v19 }
   0xb   :  { %v690_v41 = vand.u32 4294901760, %v689_v36  ;;  %v697_v47 = vand.u32 4294901760, %v696_v42  ;;  %v703_v48 = vsub.f32 %v3559_v38, %v3571_v43  ;;  %v3586_v49 = vand.u32 4294901760, %v3574_v44 }
   0xc   :  { %v121_v24 = vand.u32 4294901760, %v120_v20  ;;  %2891 = vmatprep.subr.mxu1 %v170_v21  ;;  %v131_v25 = vand.u32 4294901760, %v130_v22  ;;  %v3588_v50 = vand.u32 4294901760, %v556_v46  ;;  %v3591_v51 = vsub.f32 %v557_v40, %v3577_v45 }
   0xd   :  { %2892 = vmatpush3.msra.mxu1 %v170_v21  ;;  %v704_v53 = vand.u32 4294901760, %v703_v48  ;;  %v710_v54 = vsub.f32 %v3574_v44, %v3586_v49  ;;  %v3602_v56 = vand.u32 4294901760, %v555_v52  ;;  %v3618_v62 = vand.u32 4294901760, %v554_v58 }
   0xe   :  { %2888 = vmatprep.mubr.f32.mxu0 %v121_v24  ;;  %2893 = vmatprep.subr.mxu1 %v177_v23  ;;  %v3600_v55 = vsub.f32 %v556_v46, %v3588_v50  ;;  %v3606_v57 = vand.u32 4294901760, %v3591_v51 }
   0xf   :  { %2889 = vmatmul.mubr.f32.vlgmr.msra.gmra.mxu0 %v131_v25  ;;  %2894 = vmatpush3.msra.mxu1 %v177_v23  ;;  %v711_v59 = vand.u32 4294901760, %v710_v54  ;;  %v3616_v61 = vsub.f32 %v555_v52, %v3602_v56  ;;  %v3630_v2 = vsub.f32 %v554_v58, %v3618_v62 }
  0x10   :  { %2899 = vmatpush3.msra.mxu0 %v167_v9  ;;  %2896 = vmatmul.mubr.f32.vlgmr.msra.gmra.mxu1 %v127_v10  ;;  %v3613_v60 = vand.u32 4294901760, %v3600_v55  ;;  %v717_v63 = vsub.f32 %v3591_v51, %v3606_v57 }
  0x11   :  { %2900 = vmatprep.subr.mxu0 %v174_v11  ;;  %2905 = vmatprep.subr.mxu1 %v79_v3  ;;  %v3627_v1 = vand.u32 4294901760, %v3616_v61  ;;  %v3637_v6 = vand.u32 4294901760, %v3630_v2 }
  0x12   :  { %2901 = vmatpush3.msra.mxu0 %v174_v11  ;;  %2902 = vmatprep.mubr.f32.mxu0 %v118_v12  ;;  %v724_v0 = vsub.f32 %v3600_v55, %v3613_v60 }
  0x13   :  { %2906 = vmatpush3.msra.mxu1 %v79_v3  ;;  %2903 = vmatmul.mubr.f32.vlgmr.msra.gmra.mxu0 %v128_v14  ;;  %v731_v5 = vsub.f32 %v3616_v61, %v3627_v1 }
  0x14   :  { %2907 = vmatprep.subr.mxu1 %v82_v4  ;;  %2912 = vmatprep.subr.mxu0 %v168_v13 }
  0x15   :  { %2908 = vmatpush3.msra.mxu1 %v82_v4  ;;  %2909 = vmatprep.mubr.f32.mxu1 %v119_v16  ;;  %v732_v7 = vand.u32 4294901760, %v731_v5 }
  0x16   :  { %2913 = vmatpush3.msra.mxu0 %v168_v13  ;;  %2910 = vmatmul.mubr.f32.vlgmr.msra.gmra.mxu1 %v129_v18 }
  0x17   :  { %2914 = vmatprep.subr.mxu0 %v175_v15  ;;  %2919 = vmatprep.subr.mxu1 %v79_v3 }
  0x18   :  { %2915 = vmatpush3.msra.mxu0 %v175_v15  ;;  %2916 = vmatprep.mubr.f32.mxu0 %v117_v8 }
  0x19   :  { %2920 = vmatpush3.msra.mxu1 %v79_v3  ;;  %2917 = vmatmul.mubr.f32.vlgmr.msra.gmra.mxu0 %v127_v10  ;;  %v718_v3 = vand.u32 4294901760, %v717_v63 }
  0x1a   :  { %2921 = vmatprep.subr.mxu1 %v82_v4  ;;  %2923 = vmatprep.mubr.f32.mxu1 %v117_v8  ;;  %v738_v8 = vsub.f32 %v3630_v2, %v3637_v6 }
  0x1b   :  { %2922 = vmatpush3.msra.mxu1 %v82_v4  ;;  %2926 = vmatprep.subr.mxu0 %v3525_v27  ;;  %v725_v4 = vand.u32 4294901760, %v724_v0 }
  0x1c   :  { %2924 = vmatmul.mubr.f32.vlgmr.msra.gmra.mxu1 %v127_v10  ;;  %2927 = vmatpush3.msra.mxu0 %v3525_v27  ;;  %v739_v9 = vand.u32 4294901760, %v738_v8  ;;  %v2580_v10 = vld [vmem:[%s4515_s2] ss:$0 sm:$0xff] }
  0x1d   :  { %2928 = vmatprep.subr.mxu0 %v3533_v30  ;;  %2945 = vmatprep.subr.mxu1 %v690_v41 }
  0x1e   :  { %2929 = vmatpush3.msra.mxu0 %v3533_v30  ;;  %2946 = vmatpush3.msra.mxu1 %v690_v41 }
  0x1f   :  { %2930 = vmatprep.subr.mxu0 %v3546_v34  ;;  %2947 = vmatprep.subr.mxu1 %v697_v47 }
  0x20   :  { %2931 = vmatpush3.msra.mxu0 %v3546_v34  ;;  %2948 = vmatpush3.msra.mxu1 %v697_v47 }
  0x21   :  { %2932 = vmatprep.subr.mxu0 %v3561_v39  ;;  %2949 = vmatprep.subr.mxu1 %v704_v53 }
  0x22   :  { %2933 = vmatpush3.msra.mxu0 %v3561_v39  ;;  %2950 = vmatpush3.msra.mxu1 %v704_v53 }
  0x23   :  { %2934 = vmatprep.subr.mxu0 %v3577_v45  ;;  %2951 = vmatprep.subr.mxu1 %v711_v59 }
  0x24   :  { %2935 = vmatpush3.msra.mxu0 %v3577_v45  ;;  %2952 = vmatpush3.msra.mxu1 %v711_v59 }
  0x25   :  { %2936 = vmatprep.subr.mxu0 %v3588_v50  ;;  %2953 = vmatprep.subr.mxu1 %v718_v3 }
  0x26   :  { %2937 = vmatpush3.msra.mxu0 %v3588_v50  ;;  %2954 = vmatpush3.msra.mxu1 %v718_v3 }
  0x27   :  { %2938 = vmatprep.subr.mxu0 %v3602_v56  ;;  %2955 = vmatprep.subr.mxu1 %v725_v4 }
  0x28   :  { %2939 = vmatpush3.msra.mxu0 %v3602_v56  ;;  %2956 = vmatpush3.msra.mxu1 %v725_v4 }
  0x29   :  { %2940 = vmatprep.subr.mxu0 %v3618_v62  ;;  %2957 = vmatprep.subr.mxu1 %v732_v7 }
  0x2a   :  { %2941 = vmatpush3.msra.mxu0 %v3618_v62  ;;  %2958 = vmatpush3.msra.mxu1 %v732_v7 }
  0x2b   :  { %2964 = vmatprep.subr.mxu0 %v3531_v29  ;;  %2959 = vmatprep.subr.mxu1 %v739_v9 }
  0x2c   :  { %2960 = vmatpush3.msra.mxu1 %v739_v9 }
  0x2d   :  { %2983 = vmatprep.subr.mxu1 %v3525_v27 }
  0xcf   :  { %v2890_v11 = vpop.f32.mrf.mxu0 }
  0xd0   :  { %v134_v12 = vadd.f32 %v2890_v11, %v2580_v10  ;;  %v2897_v14 = vpop.f32.mrf.mxu1  ;;  %v1167_v11 = vld [vmem:[%s4516_s5 + $0x48] sm:$0xff] }
  0xd1   :  { %v123_v13 = vpop.f32.mrf.mxu0 }
  0xd2   :  { %v124_v15 = vadd.f32 %v2580_v10, %v123_v13  ;;  %v221_v16 = vadd.f32 %v2897_v14, %v134_v12  ;;  %v214_v17 = vpop.f32.mrf.mxu1 }
  0xd3   :  { %v2904_v19 = vpop.f32.mrf.mxu0 }
  0xd4   :  { %v215_v18 = vadd.f32 %v214_v17, %v124_v15  ;;  %v304_v20 = vadd.f32 %v2904_v19, %v221_v16  ;;  %v3797_v15 = vand.u32 4294901760, %v1167_v11  ;;  %v1166_v17 = vld [vmem:[%s4516_s5 + $0x40] sm:$0xff] }
  0xd5   :  { %v296_v21 = vpop.f32.mrf.mxu0 }
  0xd6   :  { %v297_v22 = vadd.f32 %v296_v21, %v215_v18  ;;  %v2911_v23 = vpop.f32.mrf.mxu1  ;;  %v3813_v21 = vand.u32 4294901760, %v1166_v17 }
  0xd7   :  { %v387_v24 = vadd.f32 %v2911_v23, %v304_v20  ;;  %v3811_v20 = vsub.f32 %v1167_v11, %v3797_v15  ;;  %v1165_v23 = vld [vmem:[%s4516_s5 + $0x38] sm:$0xff] }
  0xd8   :  { %v378_v25 = vpop.f32.mrf.mxu1 }
  0xd9   :  { %v379_v26 = vadd.f32 %v378_v25, %v297_v22  ;;  %v2918_v28 = vpop.f32.mrf.mxu0  ;;  %v3825_v25 = vand.u32 4294901760, %v3811_v20 }
  0xda   :  { %v470_v31 = vadd.f32 %v2918_v28, %v387_v24  ;;  %v3830_v28 = vand.u32 4294901760, %v1165_v23 }
  0xdb   :  { %v463_v35 = vpop.f32.mrf.mxu0 }
  0xdc   :  { %v2925_v36 = vpop.f32.mrf.mxu1  ;;  %v464_v40 = vadd.f32 %v463_v35, %v379_v26  ;;  %v3828_v26 = vsub.f32 %v1166_v17, %v3813_v21  ;;  %v1164_v35 = vld [vmem:[%s4516_s5 + $0x30] sm:$0xff] }
  0xdd   :  { %v549_v41 = vadd.f32 %v2925_v36, %v470_v31 }
  0xde   :  { %v542_v42 = vpop.f32.mrf.mxu1 }
  0xdf   :  { %v553_v46 = vmax.f32 %v549_v41, 0.0  ;;  %v543_v47 = vadd.f32 %v542_v42, %v464_v40  ;;  %v1328_v40 = vsub.f32 %v3811_v20, %v3825_v25  ;;  %v3840_v41 = vand.u32 4294901760, %v3828_v26 }
  0xe0   :  { %v3843_v42 = vsub.f32 %v1165_v23, %v3830_v28 }
  0xe1   :  { %v574_v48 = vsel %vm569_vm1, %v553_v46, 0  ;;  %v552_v52 = vmax.f32 %v543_v47, 0.0  ;;  %4558 = vst [vmem:[#allocation2_spill] sm:$0xff] %v3840_v41  ;;  %v3846_v46 = vand.u32 4294901760, %v1164_v35  ;;  %v1163_v47 = vld [vmem:[%s4516_s5 + $0x28] sm:$0xff] }
  0xe2   :  { %v3648_v53 = vand.u32 4294901760, %v574_v48 }
  0xe3   :  { %v571_v54 = vsel %vm569_vm1, %v552_v52, 0  ;;  %v1335_v52 = vsub.f32 %v3828_v26, %v3840_v41 }
  0xe4   :  { %v660_v58 = vsub.f32 %v574_v48, %v3648_v53  ;;  %v649_v59 = vand.u32 4294901760, %v571_v54  ;;  %v1329_v48 = vand.u32 4294901760, %v1328_v40 }
  0xe6   :  { %v661_v63 = vand.u32 4294901760, %v660_v58  ;;  %v650_v0 = vsub.f32 %v571_v54, %v649_v59  ;;  %2961 = vmatprep.mubr.f32.mxu1 %v649_v59  ;;  %v3857_v54 = vand.u32 4294901760, %v1163_v47 }
  0xe7   :  { %2962 = vmatmul.mubr.f32.vlgmr.msra.gmra.mxu1 %v3648_v53 }
  0xe8   :  { %2984 = vmatpush3.msra.mxu1 %v3525_v27  ;;  %v651_v3 = vand.u32 4294901760, %v650_v0  ;;  %v662_v4 = vsub.f32 %v660_v58, %v661_v63 }
  0xe9   :  { %2985 = vmatprep.subr.mxu1 %v3533_v30 }
  0xea   :  { %2986 = vmatpush3.msra.mxu1 %v3533_v30  ;;  %2999 = vmatprep.mubr.f32.mxu1 %v651_v3  ;;  %v652_v5 = vsub.f32 %v650_v0, %v651_v3  ;;  %v663_v8 = vand.u32 4294901760, %v662_v4  ;;  %v3870_v3 = vsub.f32 %v1163_v47, %v3857_v54 }
  0xeb   :  { %2987 = vmatprep.subr.mxu1 %v3546_v34 }
  0xec   :  { %2988 = vmatpush3.msra.mxu1 %v3546_v34  ;;  %v653_v7 = vand.u32 4294901760, %v652_v5 }
  0xed   :  { %2989 = vmatprep.subr.mxu1 %v3561_v39 }
  0xee   :  { %2990 = vmatpush3.msra.mxu1 %v3561_v39  ;;  %2942 = vmatprep.mubr.f32.mxu0 %v653_v7  ;;  %v1161_v7 = vld [vmem:[%s4516_s5 + $0x18] sm:$0xff] }
  0xef   :  { %2991 = vmatprep.subr.mxu1 %v3577_v45  ;;  %2943 = vmatmul.mubr.f32.vlgmr.msra.gmra.mxu0 %v663_v8 }
  0xf0   :  { %2965 = vmatpush3.msra.mxu0 %v3531_v29  ;;  %2992 = vmatpush3.msra.mxu1 %v3577_v45 }
  0xf1   :  { %2966 = vmatprep.subr.mxu0 %v3544_v33  ;;  %2980 = vmatprep.mubr.f32.mxu0 %v650_v0 }
  0xf2   :  { %2993 = vmatprep.subr.mxu1 %v3588_v50  ;;  %2967 = vmatpush3.msra.mxu0 %v3544_v33 }
  0xf3   :  { %2994 = vmatpush3.msra.mxu1 %v3588_v50  ;;  %2968 = vmatprep.subr.mxu0 %v3559_v38 }
  0xf4   :  { %2995 = vmatprep.subr.mxu1 %v3602_v56  ;;  %2969 = vmatpush3.msra.mxu0 %v3559_v38 }
  0xf5   :  { %2996 = vmatpush3.msra.mxu1 %v3602_v56  ;;  %2970 = vmatprep.subr.mxu0 %v3574_v44 }
  0xf6   :  { %2997 = vmatprep.subr.mxu1 %v3618_v62  ;;  %2971 = vmatpush3.msra.mxu0 %v3574_v44 }
  0xf7   :  { %2998 = vmatpush3.msra.mxu1 %v3618_v62  ;;  %2972 = vmatprep.subr.mxu0 %v3591_v51 }
  0xf8   :  { %3000 = vmatmul.mubr.f32.vlgmr.msra.gmra.mxu1 %v661_v63  ;;  %3021 = vmatprep.subr.mxu1 %v3525_v27  ;;  %v1336_v63 = vand.u32 4294901760, %v1335_v52 }
  0xf9   :  { %2973 = vmatpush3.msra.mxu0 %v3591_v51  ;;  %3022 = vmatpush3.msra.mxu1 %v3525_v27  ;;  %v1173_v27 = vld [vmem:[%s4516_s5 + $0x78] sm:$0xff] }
  0xfa   :  { %3037 = vmatprep.mubr.f32.mxu1 %v649_v59  ;;  %2974 = vmatprep.subr.mxu0 %v3600_v55  ;;  %v3720_v29 = vand.u32 4294901760, %v1173_v27  ;;  %v1169_v51 = vld [vmem:[%s4516_s5 + $0x58] sm:$0xff] }
  0xfb   :  { %3023 = vmatprep.subr.mxu1 %v3533_v30  ;;  %2975 = vmatpush3.msra.mxu0 %v3600_v55 }
  0xfc   :  { %3024 = vmatpush3.msra.mxu1 %v3533_v30  ;;  %2976 = vmatprep.subr.mxu0 %v3616_v61  ;;  %v1172_v30 = vld [vmem:[%s4516_s5 + $0x70] sm:$0xff] }
  0xfd   :  { %3025 = vmatprep.subr.mxu1 %v3546_v34  ;;  %2977 = vmatpush3.msra.mxu0 %v3616_v61  ;;  %v3728_v33 = vand.u32 4294901760, %v1172_v30  ;;  %v3772_v61 = vand.u32 4294901760, %v1169_v51 }
  0xfe   :  { %3026 = vmatpush3.msra.mxu1 %v3546_v34  ;;  %2978 = vmatprep.subr.mxu0 %v3630_v2  ;;  %v1171_v34 = vld [vmem:[%s4516_s5 + $0x68] sm:$0xff] }
  0xff   :  { %3027 = vmatprep.subr.mxu1 %v3561_v39  ;;  %2979 = vmatpush3.msra.mxu0 %v3630_v2  ;;  %v3739_v38 = vsub.f32 %v1172_v30, %v3728_v33  ;;  %v3786_v10 = vsub.f32 %v1169_v51, %v3772_v61 }
 0x100   :  { %3028 = vmatpush3.msra.mxu1 %v3561_v39  ;;  %2981 = vmatmul.mubr.f32.vlgmr.msra.gmra.mxu0 %v660_v58  ;;  %v3741_v39 = vand.u32 4294901760, %v1171_v34  ;;  %v3861_v58 = vsub.f32 %v1164_v35, %v3846_v46 }
 0x101   :  { %3002 = vmatprep.subr.mxu0 %v3541_v32  ;;  %3029 = vmatprep.subr.mxu1 %v3577_v45  ;;  %v3801_v16 = vand.u32 4294901760, %v3786_v10 }
 0x102   :  { %3003 = vmatpush3.msra.mxu0 %v3541_v32  ;;  %3018 = vmatprep.mubr.f32.mxu0 %v649_v59  ;;  %v3726_v32 = vsub.f32 %v1173_v27, %v3720_v29  ;;  %v1162_v59 = vld [vmem:[%s4516_s5 + $0x20] sm:$0xff]  ;;  %v3876_v5 = vand.u32 4294901760, %v3861_v58  ;;  %v3883_v27 = vand.u32 4294901760, %v3870_v3 }
 0x103   :  { %3030 = vmatpush3.msra.mxu1 %v3577_v45  ;;  %3004 = vmatprep.subr.mxu0 %v3556_v37  ;;  %v3751_v45 = vand.u32 4294901760, %v3739_v38  ;;  %v1314_v22 = vsub.f32 %v3786_v10, %v3801_v16  ;;  %v3872_v4 = vand.u32 4294901760, %v1162_v59 }
 0x104   :  { %3031 = vmatprep.subr.mxu1 %v3588_v50  ;;  %3005 = vmatpush3.msra.mxu0 %v3556_v37  ;;  %v3736_v37 = vand.u32 4294901760, %v3726_v32  ;;  %4560 = vst [vmem:[#allocation4_spill] sm:$0xff] %v3876_v5  ;;  %4561 = vst [vmem:[#allocation5_spill] sm:$0xff] %v3883_v27  ;;  %v1356_v51 = vsub.f32 %v3870_v3, %v3883_v27 }
 0x105   :  { %3032 = vmatpush3.msra.mxu1 %v3588_v50  ;;  %3006 = vmatprep.subr.mxu0 %v3571_v43  ;;  %v1315_v31 = vand.u32 4294901760, %v1314_v22  ;;  %v3886_v30 = vsub.f32 %v1162_v59, %v3872_v4  ;;  %v1158_v22 = vld [vmem:[%s4516_s5] sm:$0xff] }
 0x106   :  { %3033 = vmatprep.subr.mxu1 %v3602_v56  ;;  %3007 = vmatpush3.msra.mxu0 %v3571_v43  ;;  %v1170_v43 = vld [vmem:[%s4516_s5 + $0x60] sm:$0xff]  ;;  %v1286_v44 = vsub.f32 %v3726_v32, %v3736_v37  ;;  %v1357_v11 = vand.u32 4294901760, %v1356_v51  ;;  %v3932_v35 = vand.u32 4294901760, %v1158_v22 }
 0x107   :  { %3034 = vmatpush3.msra.mxu1 %v3602_v56  ;;  %3008 = vmatprep.subr.mxu0 %v3586_v49  ;;  %v3756_v50 = vand.u32 4294901760, %v1170_v43  ;;  %v1293_v56 = vsub.f32 %v3739_v38, %v3751_v45  ;;  %v2581_v51 = vld [vmem:[%s4517_s4] ss:$0 sm:$0xff] }
 0x108   :  { %3035 = vmatprep.subr.mxu1 %v3618_v62  ;;  %3009 = vmatpush3.msra.mxu0 %v3586_v49  ;;  %v3754_v49 = vsub.f32 %v1171_v34, %v3741_v39  ;;  %v1287_v55 = vand.u32 4294901760, %v1286_v44  ;;  %v3888_v34 = vand.u32 4294901760, %v1161_v7  ;;  %v1160_v44 = vld [vmem:[%s4516_s5 + $0x10] sm:$0xff] }
 0x109   :  { %3036 = vmatpush3.msra.mxu1 %v3618_v62  ;;  %3010 = vmatprep.subr.mxu0 %v3606_v57  ;;  %v1168_v62 = vld [vmem:[%s4516_s5 + $0x50] sm:$0xff] }
 0x10a   :  { %3038 = vmatmul.mubr.f32.vlgmr.msra.gmra.mxu1 %v3648_v53  ;;  %3011 = vmatpush3.msra.mxu0 %v3606_v57  ;;  %v3766_v57 = vand.u32 4294901760, %v3754_v49  ;;  %v3783_v9 = vand.u32 4294901760, %v1168_v62 }
 0x10b   :  { %3012 = vmatprep.subr.mxu0 %v3613_v60  ;;  %3075 = vmatprep.subr.mxu1 %v1287_v55 }
 0x10c   :  { %3013 = vmatpush3.msra.mxu0 %v3613_v60  ;;  %v3769_v60 = vsub.f32 %v1170_v43, %v3756_v50  ;;  %v1300_v2 = vsub.f32 %v3754_v49, %v3766_v57  ;;  %3076 = vmatpush3.msra.mxu1 %v1287_v55  ;;  %v3795_v14 = vsub.f32 %v1168_v62, %v3783_v9  ;;  %v3900_v55 = vand.u32 4294901760, %v3886_v30 }
 0x10d   :  { %3014 = vmatprep.subr.mxu0 %v3627_v1  ;;  %v1349_v43 = vsub.f32 %v3861_v58, %v3876_v5  ;;  %v3905_v62 = vand.u32 4294901760, %v1160_v44 }
 0x10e   :  { %3015 = vmatpush3.msra.mxu0 %v3627_v1  ;;  %v1294_v1 = vand.u32 4294901760, %v1293_v56  ;;  %v1301_v12 = vand.u32 4294901760, %v1300_v2  ;;  %v3808_v19 = vand.u32 4294901760, %v3795_v14  ;;  %4562 = vst [vmem:[#allocation6_spill] sm:$0xff] %v3900_v55  ;;  %v3903_v56 = vsub.f32 %v1161_v7, %v3888_v34  ;;  %v1159_v2 = vld [vmem:[%s4516_s5 + $0x8] sm:$0xff] }
 0x10f   :  { %3016 = vmatprep.subr.mxu0 %v3637_v6  ;;  %v3918_v17 = vsub.f32 %v1160_v44, %v3905_v62 }
 0x110   :  { %3017 = vmatpush3.msra.mxu0 %v3637_v6  ;;  %v3781_v6 = vand.u32 4294901760, %v3769_v60  ;;  %3077 = vmatprep.subr.mxu1 %v1294_v1  ;;  %v1321_v24 = vsub.f32 %v3795_v14, %v3808_v19 }
 0x111   :  { %3019 = vmatmul.mubr.f32.vlgmr.msra.gmra.mxu0 %v3648_v53  ;;  %3040 = vmatprep.subr.mxu0 %v3720_v29  ;;  %v3855_v53 = vand.u32 4294901760, %v3843_v42 }
 0x112   :  { %3041 = vmatpush3.msra.mxu0 %v3720_v29  ;;  %v1307_v13 = vsub.f32 %v3769_v60, %v3781_v6  ;;  %3078 = vmatpush3.msra.mxu1 %v1294_v1  ;;  %v1322_v36 = vand.u32 4294901760, %v1321_v24  ;;  %v1350_v1 = vand.u32 4294901760, %v1349_v43 }
 0x113   :  { %3042 = vmatprep.subr.mxu0 %v3728_v33  ;;  %3079 = vmatprep.subr.mxu1 %v1301_v12  ;;  %4559 = vst [vmem:[#allocation3_spill] sm:$0xff] %v3855_v53  ;;  %v1342_v0 = vsub.f32 %v3843_v42, %v3855_v53 }
 0x114   :  { %3043 = vmatpush3.msra.mxu0 %v3728_v33  ;;  %v1308_v18 = vand.u32 4294901760, %v1307_v13  ;;  %3080 = vmatpush3.msra.mxu1 %v1301_v12  ;;  %v1363_v12 = vsub.f32 %v3886_v30, %v3900_v55  ;;  %v3915_v13 = vand.u32 4294901760, %v3903_v56 }
 0x115   :  { %3044 = vmatprep.subr.mxu0 %v3741_v39  ;;  %v1343_v8 = vand.u32 4294901760, %v1342_v0 }
 0x116   :  { %3045 = vmatpush3.msra.mxu0 %v3741_v39  ;;  %3081 = vmatprep.subr.mxu1 %v1308_v18  ;;  %4563 = vst [vmem:[#allocation7_spill] sm:$0xff] %v3915_v13  ;;  %v1364_v23 = vand.u32 4294901760, %v1363_v12  ;;  %v1370_v24 = vsub.f32 %v3903_v56, %v3915_v13 }
 0x117   :  { %3046 = vmatprep.subr.mxu0 %v3756_v50  ;;  %3082 = vmatpush3.msra.mxu1 %v1308_v18  ;;  %v3921_v18 = vand.u32 4294901760, %v1159_v2 }
 0x118   :  { %3047 = vmatpush3.msra.mxu0 %v3756_v50  ;;  %3083 = vmatprep.subr.mxu1 %v1315_v31  ;;  %v1371_v40 = vand.u32 4294901760, %v1370_v24 }
 0x119   :  { %3048 = vmatprep.subr.mxu0 %v3772_v61  ;;  %3084 = vmatpush3.msra.mxu1 %v1315_v31  ;;  %v3930_v31 = vand.u32 4294901760, %v3918_v17 }
 0x11a   :  { %3049 = vmatpush3.msra.mxu0 %v3772_v61  ;;  %3085 = vmatprep.subr.mxu1 %v1322_v36 }
 0x11b   :  { %3050 = vmatprep.subr.mxu0 %v3783_v9  ;;  %3086 = vmatpush3.msra.mxu1 %v1322_v36  ;;  %4564 = vst [vmem:[#allocation8_spill] sm:$0xff] %v3930_v31  ;;  %v3936_v36 = vsub.f32 %v1159_v2, %v3921_v18  ;;  %v1377_v47 = vsub.f32 %v3918_v17, %v3930_v31 }
 0x11c   :  { %3051 = vmatpush3.msra.mxu0 %v3783_v9  ;;  %3087 = vmatprep.subr.mxu1 %v1329_v48 }
 0x11d   :  { %3052 = vmatprep.subr.mxu0 %v3797_v15  ;;  %3088 = vmatpush3.msra.mxu1 %v1329_v48  ;;  %v3942_v48 = vsub.f32 %v1158_v22, %v3932_v35  ;;  %v3946_v52 = vand.u32 4294901760, %v3936_v36  ;;  %v1378_v59 = vand.u32 4294901760, %v1377_v47 }
 0x11e   :  { %3053 = vmatpush3.msra.mxu0 %v3797_v15  ;;  %3089 = vmatprep.subr.mxu1 %v1336_v63 }
 0x11f   :  { %3054 = vmatprep.subr.mxu0 %v3813_v21  ;;  %3090 = vmatpush3.msra.mxu1 %v1336_v63  ;;  %4565 = vst [vmem:[#allocation9_spill] sm:$0xff] %v3946_v52  ;;  %v3950_v63 = vand.u32 4294901760, %v3942_v48  ;;  %v1384_v0 = vsub.f32 %v3936_v36, %v3946_v52 }
 0x120   :  { %3055 = vmatpush3.msra.mxu0 %v3813_v21  ;;  %3091 = vmatprep.subr.mxu1 %v1343_v8 }
 0x121   :  { %3056 = vmatprep.subr.mxu0 %v3830_v28  ;;  %3092 = vmatpush3.msra.mxu1 %v1343_v8  ;;  %4566 = vst [vmem:[#allocation10_spill] sm:$0xff] %v3950_v63  ;;  %v1391_v7 = vsub.f32 %v3942_v48, %v3950_v63  ;;  %v1385_v8 = vand.u32 4294901760, %v1384_v0 }
 0x122   :  { %3057 = vmatpush3.msra.mxu0 %v3830_v28  ;;  %3093 = vmatprep.subr.mxu1 %v1350_v1 }
 0x123   :  { %3058 = vmatprep.subr.mxu0 %v3846_v46  ;;  %3094 = vmatpush3.msra.mxu1 %v1350_v1  ;;  %v1392_v43 = vand.u32 4294901760, %v1391_v7 }
 0x124   :  { %3059 = vmatpush3.msra.mxu0 %v3846_v46  ;;  %3095 = vmatprep.subr.mxu1 %v1357_v11 }
 0x125   :  { %3060 = vmatprep.subr.mxu0 %v3857_v54  ;;  %3096 = vmatpush3.msra.mxu1 %v1357_v11 }
 0x126   :  { %3061 = vmatpush3.msra.mxu0 %v3857_v54  ;;  %3097 = vmatprep.subr.mxu1 %v1364_v23 }
 0x127   :  { %3062 = vmatprep.subr.mxu0 %v3872_v4  ;;  %3098 = vmatpush3.msra.mxu1 %v1364_v23 }
 0x128   :  { %3063 = vmatpush3.msra.mxu0 %v3872_v4  ;;  %3099 = vmatprep.subr.mxu1 %v1371_v40 }
 0x129   :  { %3064 = vmatprep.subr.mxu0 %v3888_v34  ;;  %3100 = vmatpush3.msra.mxu1 %v1371_v40 }
 0x12a   :  { %3065 = vmatpush3.msra.mxu0 %v3888_v34  ;;  %3101 = vmatprep.subr.mxu1 %v1378_v59 }
 0x12b   :  { %3066 = vmatprep.subr.mxu0 %v3905_v62  ;;  %3102 = vmatpush3.msra.mxu1 %v1378_v59 }
 0x12c   :  { %3067 = vmatpush3.msra.mxu0 %v3905_v62  ;;  %3103 = vmatprep.subr.mxu1 %v1385_v8 }
 0x12d   :  { %3068 = vmatprep.subr.mxu0 %v3921_v18  ;;  %3104 = vmatpush3.msra.mxu1 %v1385_v8 }
 0x12e   :  { %3069 = vmatpush3.msra.mxu0 %v3921_v18  ;;  %3105 = vmatprep.subr.mxu1 %v1392_v43 }
 0x12f   :  { %3070 = vmatprep.subr.mxu0 %v3932_v35  ;;  %3106 = vmatpush3.msra.mxu1 %v1392_v43 }
 0x130   :  { %3071 = vmatpush3.msra.mxu0 %v3932_v35  ;;  %3145 = vmatprep.subr.mxu1 %v3720_v29 }
 0x131   :  { %3110 = vmatprep.subr.mxu0 %v3726_v32 }
 0x1a7   :  { %v2963_v1 = vpop.f32.mrf.mxu1 }
 0x1a9   :  { %v776_v23 = vpop.f32.mrf.mxu1 }
 0x1af   :  { %v2944_v44 = vpop.f32.mrf.mxu0 }
 0x1b0   :  { %v666_v11 = vadd.f32 %v2944_v44, %v2581_v51 }
 0x1b1   :  { %v655_v2 = vpop.f32.mrf.mxu0 }
 0x1b2   :  { %v656_v22 = vadd.f32 %v2581_v51, %v655_v2  ;;  %v783_v24 = vadd.f32 %v2963_v1, %v666_v11 }
 0x1b4   :  { %v777_v0 = vadd.f32 %v776_v23, %v656_v22 }
 0x1b8   :  { %v3001_v40 = vpop.f32.mrf.mxu1 }
 0x1ba   :  { %v958_v8 = vpop.f32.mrf.mxu1 }
 0x1c0   :  { %v2982_v12 = vpop.f32.mrf.mxu0 }
 0x1c1   :  { %v878_v59 = vadd.f32 %v2982_v12, %v783_v24 }
 0x1c2   :  { %v870_v47 = vpop.f32.mrf.mxu0 }
 0x1c3   :  { %v871_v7 = vadd.f32 %v870_v47, %v777_v0  ;;  %v967_v43 = vadd.f32 %v3001_v40, %v878_v59  ;;  %v1875_v59 = vld [vmem:[%s4518_s7 + $0x40] sm:$0xff] }
 0x1c5   :  { %v959_v13 = vadd.f32 %v958_v8, %v871_v7  ;;  %v4215_v8 = vand.u32 4294901760, %v1875_v59 }
 0x1ca   :  { %v3039_v63 = vpop.f32.mrf.mxu1 }
 0x1cc   :  { %v1146_v53 = vpop.f32.mrf.mxu1 }
 0x1d1   :  { %v3020_v52 = vpop.f32.mrf.mxu0 }
 0x1d2   :  { %v1068_v31 = vadd.f32 %v3020_v52, %v967_v43  ;;  %v1874_v43 = vld [vmem:[%s4518_s7 + $0x38] sm:$0xff] }
 0x1d3   :  { %v1061_v55 = vpop.f32.mrf.mxu0 }
 0x1d4   :  { %v1153_v27 = vadd.f32 %v3039_v63, %v1068_v31  ;;  %v1062_v5 = vadd.f32 %v1061_v55, %v959_v13 }
 0x1d6   :  { %v1157_v44 = vmax.f32 %v1153_v27, 0.0  ;;  %v1147_v41 = vadd.f32 %v1146_v53, %v1062_v5 }
 0x1d8   :  { %v3962_v51 = vand.u32 4294901760, %v1157_v44  ;;  %v1156_v1 = vmax.f32 %v1147_v41, 0.0 }
 0x1da   :  { %v3965_v2 = vsub.f32 %v1157_v44, %v3962_v51  ;;  %v3967_v11 = vand.u32 4294901760, %v1156_v1 }
 0x1dc   :  { %v1274_v12 = vand.u32 4294901760, %v3965_v2  ;;  %v1263_v22 = vsub.f32 %v1156_v1, %v3967_v11  ;;  %3107 = vmatprep.mubr.f32.mxu1 %v3967_v11  ;;  %v4225_v1 = vand.u32 4294901760, %v1874_v43 }
 0x1dd   :  { %3108 = vmatmul.mubr.f32.vlgmr.msra.gmra.mxu1 %v3962_v51 }
 0x1de   :  { %3146 = vmatpush3.msra.mxu1 %v3720_v29  ;;  %v1264_v27 = vand.u32 4294901760, %v1263_v22  ;;  %v1275_v41 = vsub.f32 %v3965_v2, %v1274_v12 }
 0x1df   :  { %3147 = vmatprep.subr.mxu1 %v3728_v33 }
 0x1e0   :  { %3148 = vmatpush3.msra.mxu1 %v3728_v33  ;;  %3177 = vmatprep.mubr.f32.mxu1 %v1264_v27  ;;  %v1265_v53 = vsub.f32 %v1263_v22, %v1264_v27  ;;  %v1276_v55 = vand.u32 4294901760, %v1275_v41  ;;  %v1872_v41 = vld [vmem:[%s4518_s7 + $0x28] sm:$0xff] }
 0x1e1   :  { %3149 = vmatprep.subr.mxu1 %v3741_v39 }
 0x1e2   :  { %3150 = vmatpush3.msra.mxu1 %v3741_v39  ;;  %v1266_v5 = vand.u32 4294901760, %v1265_v53 }
 0x1e3   :  { %3151 = vmatprep.subr.mxu1 %v3756_v50 }
 0x1e4   :  { %3152 = vmatpush3.msra.mxu1 %v3756_v50  ;;  %3072 = vmatprep.mubr.f32.mxu0 %v1266_v5 }
 0x1e5   :  { %3153 = vmatprep.subr.mxu1 %v3772_v61  ;;  %3073 = vmatmul.mubr.f32.vlgmr.msra.gmra.mxu0 %v1276_v55 }
 0x1e6   :  { %3111 = vmatpush3.msra.mxu0 %v3726_v32  ;;  %3154 = vmatpush3.msra.mxu1 %v3772_v61  ;;  %v4568_v32 = vld [vmem:[#allocation3_spill] sm:$0xff] }
 0x1e7   :  { %3112 = vmatprep.subr.mxu0 %v3739_v38  ;;  %3142 = vmatprep.mubr.f32.mxu0 %v1263_v22  ;;  %v4236_v22 = vsub.f32 %v1874_v43, %v4225_v1 }
 0x1e8   :  { %3155 = vmatprep.subr.mxu1 %v3783_v9  ;;  %3113 = vmatpush3.msra.mxu0 %v3739_v38  ;;  %v4571_v38 = vld [vmem:[#allocation6_spill] sm:$0xff] }
 0x1e9   :  { %3156 = vmatpush3.msra.mxu1 %v3783_v9  ;;  %3114 = vmatprep.subr.mxu0 %v3754_v49  ;;  %v4248_v5 = vand.u32 4294901760, %v4236_v22 }
 0x1ea   :  { %3157 = vmatprep.subr.mxu1 %v3797_v15  ;;  %3115 = vmatpush3.msra.mxu0 %v3754_v49  ;;  %v4574_v49 = vld [vmem:[#allocation9_spill] sm:$0xff] }
 0x1eb   :  { %3158 = vmatpush3.msra.mxu1 %v3797_v15  ;;  %3116 = vmatprep.subr.mxu0 %v3769_v60  ;;  %4577 = vst [vmem:[#allocation3_spill] sm:$0xff] %v4248_v5 }
 0x1ec   :  { %3159 = vmatprep.subr.mxu1 %v3813_v21  ;;  %3117 = vmatpush3.msra.mxu0 %v3769_v60 }
 0x1ed   :  { %3160 = vmatpush3.msra.mxu1 %v3813_v21  ;;  %3118 = vmatprep.subr.mxu0 %v3786_v10 }
 0x1ee   :  { %3161 = vmatprep.subr.mxu1 %v3830_v28  ;;  %3119 = vmatpush3.msra.mxu0 %v3786_v10 }
 0x1ef   :  { %3162 = vmatpush3.msra.mxu1 %v3830_v28  ;;  %3120 = vmatprep.subr.mxu0 %v3795_v14 }
 0x1f0   :  { %3163 = vmatprep.subr.mxu1 %v3846_v46  ;;  %3121 = vmatpush3.msra.mxu0 %v3795_v14 }
 0x1f1   :  { %3164 = vmatpush3.msra.mxu1 %v3846_v46  ;;  %3122 = vmatprep.subr.mxu0 %v3811_v20 }
 0x1f2   :  { %3165 = vmatprep.subr.mxu1 %v3857_v54  ;;  %3123 = vmatpush3.msra.mxu0 %v3811_v20  ;;  %v1876_v20 = vld [vmem:[%s4518_s7 + $0x48] sm:$0xff] }
 0x1f3   :  { %3166 = vmatpush3.msra.mxu1 %v3857_v54  ;;  %3124 = vmatprep.subr.mxu0 %v3828_v26 }
 0x1f4   :  { %3167 = vmatprep.subr.mxu1 %v3872_v4  ;;  %3125 = vmatpush3.msra.mxu0 %v3828_v26 }
 0x1f5   :  { %3168 = vmatpush3.msra.mxu1 %v3872_v4  ;;  %3126 = vmatprep.subr.mxu0 %v3843_v42 }
 0x1f6   :  { %3169 = vmatprep.subr.mxu1 %v3888_v34  ;;  %3127 = vmatpush3.msra.mxu0 %v3843_v42 }
 0x1f7   :  { %3170 = vmatpush3.msra.mxu1 %v3888_v34  ;;  %3128 = vmatprep.subr.mxu0 %v3861_v58 }
 0x1f8   :  { %3171 = vmatprep.subr.mxu1 %v3905_v62  ;;  %3129 = vmatpush3.msra.mxu0 %v3861_v58 }
 0x1f9   :  { %3172 = vmatpush3.msra.mxu1 %v3905_v62  ;;  %3130 = vmatprep.subr.mxu0 %v3870_v3 }
 0x1fa   :  { %3173 = vmatprep.subr.mxu1 %v3921_v18  ;;  %3131 = vmatpush3.msra.mxu0 %v3870_v3 }
 0x1fb   :  { %3174 = vmatpush3.msra.mxu1 %v3921_v18  ;;  %3132 = vmatprep.subr.mxu0 %v3886_v30 }
 0x1fc   :  { %3175 = vmatprep.subr.mxu1 %v3932_v35  ;;  %3133 = vmatpush3.msra.mxu0 %v3886_v30 }
 0x1fd   :  { %3176 = vmatpush3.msra.mxu1 %v3932_v35  ;;  %3134 = vmatprep.subr.mxu0 %v3903_v56 }
 0x1fe   :  { %3178 = vmatmul.mubr.f32.vlgmr.msra.gmra.mxu1 %v1274_v12  ;;  %3215 = vmatprep.subr.mxu1 %v3720_v29 }
 0x1ff   :  { %3135 = vmatpush3.msra.mxu0 %v3903_v56  ;;  %3216 = vmatpush3.msra.mxu1 %v3720_v29  ;;  %v4567_v29 = vld [vmem:[#allocation2_spill] sm:$0xff] }
 0x200   :  { %3247 = vmatprep.mubr.f32.mxu1 %v3967_v11  ;;  %3136 = vmatprep.subr.mxu0 %v3918_v17 }
 0x201   :  { %3217 = vmatprep.subr.mxu1 %v3728_v33  ;;  %3137 = vmatpush3.msra.mxu0 %v3918_v17 }
 0x202   :  { %3218 = vmatpush3.msra.mxu1 %v3728_v33  ;;  %3138 = vmatprep.subr.mxu0 %v3936_v36  ;;  %v4569_v33 = vld [vmem:[#allocation4_spill] sm:$0xff] }
 0x203   :  { %3219 = vmatprep.subr.mxu1 %v3741_v39  ;;  %3139 = vmatpush3.msra.mxu0 %v3936_v36 }
 0x204   :  { %3220 = vmatpush3.msra.mxu1 %v3741_v39  ;;  %3140 = vmatprep.subr.mxu0 %v3942_v48  ;;  %v4572_v39 = vld [vmem:[#allocation7_spill] sm:$0xff] }
 0x205   :  { %3221 = vmatprep.subr.mxu1 %v3756_v50  ;;  %3141 = vmatpush3.msra.mxu0 %v3942_v48 }
 0x206   :  { %3222 = vmatpush3.msra.mxu1 %v3756_v50  ;;  %3143 = vmatmul.mubr.f32.vlgmr.msra.gmra.mxu0 %v3965_v2  ;;  %v4575_v50 = vld [vmem:[#allocation10_spill] sm:$0xff]  ;;  %v1873_v2 = vld [vmem:[%s4518_s7 + $0x30] sm:$0xff] }
 0x207   :  { %3180 = vmatprep.subr.mxu0 %v3736_v37  ;;  %3223 = vmatprep.subr.mxu1 %v3772_v61  ;;  %v4238_v27 = vand.u32 4294901760, %v1873_v2 }
 0x208   :  { %3181 = vmatpush3.msra.mxu0 %v3736_v37  ;;  %3212 = vmatprep.mubr.f32.mxu0 %v3967_v11  ;;  %v4570_v37 = vld [vmem:[#allocation5_spill] sm:$0xff] }
 0x209   :  { %3224 = vmatpush3.msra.mxu1 %v3772_v61  ;;  %3182 = vmatprep.subr.mxu0 %v3751_v45  ;;  %v1881_v61 = vld [vmem:[%s4518_s7 + $0x70] sm:$0xff]  ;;  %v4251_v55 = vsub.f32 %v1873_v2, %v4238_v27 }
 0x20a   :  { %3225 = vmatprep.subr.mxu1 %v3783_v9  ;;  %3183 = vmatpush3.msra.mxu0 %v3751_v45  ;;  %v4573_v45 = vld [vmem:[#allocation8_spill] sm:$0xff]  ;;  %v4123_v10 = vand.u32 4294901760, %v1881_v61 }
 0x20b   :  { %3226 = vmatpush3.msra.mxu1 %v3783_v9  ;;  %3184 = vmatprep.subr.mxu0 %v3766_v57  ;;  %v1879_v9 = vld [vmem:[%s4518_s7 + $0x60] sm:$0xff] }
 0x20c   :  { %3227 = vmatprep.subr.mxu1 %v3797_v15  ;;  %3185 = vmatpush3.msra.mxu0 %v3766_v57  ;;  %v1882_v57 = vld [vmem:[%s4518_s7 + $0x78] sm:$0xff]  ;;  %v4149_v42 = vsub.f32 %v1881_v61, %v4123_v10 }
 0x20d   :  { %3228 = vmatpush3.msra.mxu1 %v3797_v15  ;;  %3186 = vmatprep.subr.mxu0 %v3781_v6  ;;  %v4112_v60 = vand.u32 4294901760, %v1882_v57  ;;  %v4127_v15 = vand.u32 4294901760, %v1879_v9 }
 0x20e   :  { %3229 = vmatprep.subr.mxu1 %v3813_v21  ;;  %3187 = vmatpush3.msra.mxu0 %v3781_v6  ;;  %v1880_v6 = vld [vmem:[%s4518_s7 + $0x68] sm:$0xff]  ;;  %v4169_v30 = vand.u32 4294901760, %v4149_v42 }
 0x20f   :  { %3230 = vmatpush3.msra.mxu1 %v3813_v21  ;;  %3188 = vmatprep.subr.mxu0 %v3801_v16  ;;  %v4125_v14 = vand.u32 4294901760, %v1880_v6  ;;  %v4139_v21 = vsub.f32 %v1882_v57, %v4112_v60 }
 0x210   :  { %3231 = vmatprep.subr.mxu1 %v3830_v28  ;;  %3189 = vmatpush3.msra.mxu0 %v3801_v16  ;;  %v1878_v16 = vld [vmem:[%s4518_s7 + $0x58] sm:$0xff] }
 0x211   :  { %3232 = vmatpush3.msra.mxu1 %v3830_v28  ;;  %3190 = vmatprep.subr.mxu0 %v3808_v19  ;;  %v4146_v28 = vand.u32 4294901760, %v1876_v20  ;;  %v4159_v58 = vand.u32 4294901760, %v4139_v21 }
 0x212   :  { %3233 = vmatprep.subr.mxu1 %v3846_v46  ;;  %3191 = vmatpush3.msra.mxu0 %v3808_v19  ;;  %v1877_v19 = vld [vmem:[%s4518_s7 + $0x50] sm:$0xff] }
 0x213   :  { %3234 = vmatpush3.msra.mxu1 %v3846_v46  ;;  %3192 = vmatprep.subr.mxu0 %v3825_v25  ;;  %v4144_v26 = vand.u32 4294901760, %v1877_v19  ;;  %v4152_v46 = vsub.f32 %v1880_v6, %v4125_v14  ;;  %v4185_v17 = vsub.f32 %v1876_v20, %v4146_v28 }
 0x214   :  { %3235 = vmatprep.subr.mxu1 %v3857_v54  ;;  %3193 = vmatpush3.msra.mxu0 %v3825_v25  ;;  %v4142_v25 = vand.u32 4294901760, %v1878_v16 }
 0x215   :  { %3236 = vmatpush3.msra.mxu1 %v3857_v54  ;;  %3194 = vmatprep.subr.mxu0 %v4567_v29  ;;  %v4155_v54 = vsub.f32 %v1879_v9, %v4127_v15  ;;  %v4202_v24 = vand.u32 4294901760, %v4185_v17 }
 0x216   :  { %3237 = vmatprep.subr.mxu1 %v3872_v4  ;;  %3195 = vmatpush3.msra.mxu0 %v4567_v29  ;;  %v4162_v3 = vsub.f32 %v1878_v16, %v4142_v25  ;;  %v4253_v29 = vand.u32 4294901760, %v1872_v41  ;;  %v1869_v16 = vld [vmem:[%s4518_s7 + $0x10] sm:$0xff] }
 0x217   :  { %3238 = vmatpush3.msra.mxu1 %v3872_v4  ;;  %3196 = vmatprep.subr.mxu0 %v4568_v32  ;;  %v4166_v4 = vsub.f32 %v1877_v19, %v4144_v26  ;;  %v4175_v56 = vand.u32 4294901760, %v4155_v54  ;;  %v2037_v7 = vsub.f32 %v4185_v17, %v4202_v24 }
 0x218   :  { %3239 = vmatprep.subr.mxu1 %v3888_v34  ;;  %3197 = vmatpush3.msra.mxu0 %v4568_v32  ;;  %v4181_v13 = vand.u32 4294901760, %v4162_v3  ;;  %v1871_v32 = vld [vmem:[%s4518_s7 + $0x20] sm:$0xff] }
 0x219   :  { %3240 = vmatpush3.msra.mxu1 %v3888_v34  ;;  %3198 = vmatprep.subr.mxu0 %v4569_v33  ;;  %v4172_v34 = vand.u32 4294901760, %v4152_v46  ;;  %v2016_v36 = vsub.f32 %v4155_v54, %v4175_v56  ;;  %v4195_v48 = vand.u32 4294901760, %v4166_v4  ;;  %v2038_v11 = vand.u32 4294901760, %v2037_v7 }
 0x21a   :  { %3241 = vmatprep.subr.mxu1 %v3905_v62  ;;  %3199 = vmatpush3.msra.mxu0 %v4569_v33  ;;  %v2023_v23 = vsub.f32 %v4162_v3, %v4181_v13 }
 0x21b   :  { %3242 = vmatpush3.msra.mxu1 %v3905_v62  ;;  %3200 = vmatprep.subr.mxu0 %v4570_v37  ;;  %v1995_v62 = vsub.f32 %v4139_v21, %v4159_v58  ;;  %v2009_v31 = vsub.f32 %v4152_v46, %v4172_v34  ;;  %v2017_v40 = vand.u32 4294901760, %v2016_v36  ;;  %v2030_v47 = vsub.f32 %v4166_v4, %v4195_v48 }
 0x21c   :  { %3243 = vmatprep.subr.mxu1 %v3921_v18  ;;  %3201 = vmatpush3.msra.mxu0 %v4570_v37  ;;  %v2024_v0 = vand.u32 4294901760, %v2023_v23  ;;  %v2051_v37 = vsub.f32 %v4236_v22, %v4248_v5 }
 0x21d   :  { %3244 = vmatpush3.msra.mxu1 %v3921_v18  ;;  %3202 = vmatprep.subr.mxu0 %v4571_v38  ;;  %v2002_v18 = vsub.f32 %v4149_v42, %v4169_v30  ;;  %v2010_v63 = vand.u32 4294901760, %v2009_v31  ;;  %v2031_v44 = vand.u32 4294901760, %v2030_v47  ;;  %v1867_v47 = vld [vmem:[%s4518_s7] sm:$0xff] }
 0x21e   :  { %3245 = vmatprep.subr.mxu1 %v3932_v35  ;;  %3203 = vmatpush3.msra.mxu0 %v4571_v38  ;;  %v4263_v38 = vand.u32 4294901760, %v4251_v55  ;;  %v4327_v43 = vand.u32 4294901760, %v1867_v47 }
 0x21f   :  { %3246 = vmatpush3.msra.mxu1 %v3932_v35  ;;  %3204 = vmatprep.subr.mxu0 %v4572_v39  ;;  %v1996_v35 = vand.u32 4294901760, %v1995_v62  ;;  %v2003_v52 = vand.u32 4294901760, %v2002_v18  ;;  %v4294_v18 = vand.u32 4294901760, %v1869_v16 }
 0x220   :  { %3248 = vmatmul.mubr.f32.vlgmr.msra.gmra.mxu1 %v3962_v51  ;;  %3205 = vmatpush3.msra.mxu0 %v4572_v39  ;;  %4578 = vst [vmem:[#allocation4_spill] sm:$0xff] %v4263_v38  ;;  %v4266_v39 = vsub.f32 %v1872_v41, %v4253_v29  ;;  %v2058_v57 = vsub.f32 %v4251_v55, %v4263_v38 }
 0x221   :  { %3206 = vmatprep.subr.mxu0 %v4573_v45  ;;  %3285 = vmatprep.subr.mxu1 %v1996_v35 }
 0x222   :  { %3207 = vmatpush3.msra.mxu0 %v4573_v45  ;;  %3286 = vmatpush3.msra.mxu1 %v1996_v35  ;;  %v4269_v45 = vand.u32 4294901760, %v1871_v32  ;;  %v4278_v61 = vand.u32 4294901760, %v4266_v39  ;;  %v2059_v19 = vand.u32 4294901760, %v2058_v57  ;;  %v1868_v35 = vld [vmem:[%s4518_s7 + $0x8] sm:$0xff] }
 0x223   :  { %3208 = vmatprep.subr.mxu0 %v4574_v49  ;;  %3287 = vmatprep.subr.mxu1 %v2003_v52  ;;  %v4310_v23 = vand.u32 4294901760, %v1868_v35 }
 0x224   :  { %3209 = vmatpush3.msra.mxu0 %v4574_v49  ;;  %3288 = vmatpush3.msra.mxu1 %v2003_v52  ;;  %v1870_v49 = vld [vmem:[%s4518_s7 + $0x18] sm:$0xff]  ;;  %4579 = vst [vmem:[#allocation5_spill] sm:$0xff] %v4278_v61  ;;  %v4283_v9 = vsub.f32 %v1871_v32, %v4269_v45  ;;  %v2065_v20 = vsub.f32 %v4266_v39, %v4278_v61 }
 0x225   :  { %3210 = vmatprep.subr.mxu0 %v4575_v50  ;;  %3289 = vmatprep.subr.mxu1 %v2010_v63  ;;  %v4280_v6 = vand.u32 4294901760, %v1870_v49  ;;  %v4325_v7 = vsub.f32 %v1868_v35, %v4310_v23 }
 0x226   :  { %3211 = vmatpush3.msra.mxu0 %v4575_v50  ;;  %3290 = vmatpush3.msra.mxu1 %v2010_v63  ;;  %v2052_v50 = vand.u32 4294901760, %v2051_v37  ;;  %v4298_v31 = vand.u32 4294901760, %v4283_v9  ;;  %v2066_v36 = vand.u32 4294901760, %v2065_v20  ;;  %v4308_v63 = vsub.f32 %v1869_v16, %v4294_v18 }
 0x227   :  { %3213 = vmatmul.mubr.f32.vlgmr.msra.gmra.mxu0 %v3962_v51  ;;  %3250 = vmatprep.subr.mxu0 %v4112_v60  ;;  %v4223_v51 = vsub.f32 %v1875_v59, %v4215_v8  ;;  %v4292_v62 = vsub.f32 %v1870_v49, %v4280_v6  ;;  %v4334_v41 = vand.u32 4294901760, %v4325_v7 }
 0x228   :  { %3251 = vmatpush3.msra.mxu0 %v4112_v60  ;;  %3291 = vmatprep.subr.mxu1 %v2017_v40  ;;  %4580 = vst [vmem:[#allocation6_spill] sm:$0xff] %v4298_v31 }
 0x229   :  { %3252 = vmatprep.subr.mxu0 %v4123_v10  ;;  %3292 = vmatpush3.msra.mxu1 %v2017_v40  ;;  %v4233_v12 = vand.u32 4294901760, %v4223_v51  ;;  %v4305_v52 = vand.u32 4294901760, %v4292_v62  ;;  %v2072_v40 = vsub.f32 %v4283_v9, %v4298_v31  ;;  %4583 = vst [vmem:[#allocation9_spill] sm:$0xff] %v4334_v41 }
 0x22a   :  { %3253 = vmatpush3.msra.mxu0 %v4123_v10  ;;  %3293 = vmatprep.subr.mxu1 %v2024_v0 }
 0x22b   :  { %3254 = vmatprep.subr.mxu0 %v4125_v14  ;;  %4576 = vst [vmem:[#allocation2_spill] sm:$0xff] %v4233_v12  ;;  %3294 = vmatpush3.msra.mxu1 %v2024_v0  ;;  %v2044_v53 = vsub.f32 %v4223_v51, %v4233_v12  ;;  %4581 = vst [vmem:[#allocation7_spill] sm:$0xff] %v4305_v52  ;;  %v2079_v59 = vsub.f32 %v4292_v62, %v4305_v52  ;;  %v4322_v0 = vand.u32 4294901760, %v4308_v63 }
 0x22c   :  { %3255 = vmatpush3.msra.mxu0 %v4125_v14  ;;  %3295 = vmatprep.subr.mxu1 %v2031_v44 }
 0x22d   :  { %3256 = vmatprep.subr.mxu0 %v4127_v15  ;;  %3296 = vmatpush3.msra.mxu1 %v2031_v44  ;;  %v2045_v33 = vand.u32 4294901760, %v2044_v53  ;;  %4582 = vst [vmem:[#allocation8_spill] sm:$0xff] %v4322_v0  ;;  %v2073_v44 = vand.u32 4294901760, %v2072_v40  ;;  %v2080_v2 = vand.u32 4294901760, %v2079_v59  ;;  %v4337_v53 = vsub.f32 %v1867_v47, %v4327_v43 }
 0x22e   :  { %3257 = vmatpush3.msra.mxu0 %v4127_v15  ;;  %3297 = vmatprep.subr.mxu1 %v2038_v11 }
 0x22f   :  { %3258 = vmatprep.subr.mxu0 %v4142_v25  ;;  %3298 = vmatpush3.msra.mxu1 %v2038_v11  ;;  %v2086_v11 = vsub.f32 %v4308_v63, %v4322_v0  ;;  %v4344_v37 = vand.u32 4294901760, %v4337_v53 }
 0x230   :  { %3259 = vmatpush3.msra.mxu0 %v4142_v25  ;;  %3299 = vmatprep.subr.mxu1 %v2045_v33 }
 0x231   :  { %3260 = vmatprep.subr.mxu0 %v4144_v26  ;;  %3300 = vmatpush3.msra.mxu1 %v2045_v33  ;;  %v2087_v32 = vand.u32 4294901760, %v2086_v11  ;;  %v2093_v33 = vsub.f32 %v4325_v7, %v4334_v41  ;;  %4584 = vst [vmem:[#allocation10_spill] sm:$0xff] %v4344_v37 }
 0x232   :  { %3261 = vmatpush3.msra.mxu0 %v4144_v26  ;;  %3301 = vmatprep.subr.mxu1 %v2052_v50 }
 0x233   :  { %3262 = vmatprep.subr.mxu0 %v4146_v28  ;;  %3302 = vmatpush3.msra.mxu1 %v2052_v50  ;;  %v2094_v49 = vand.u32 4294901760, %v2093_v33  ;;  %v2100_v50 = vsub.f32 %v4337_v53, %v4344_v37 }
 0x234   :  { %3263 = vmatpush3.msra.mxu0 %v4146_v28  ;;  %3303 = vmatprep.subr.mxu1 %v2059_v19 }
 0x235   :  { %3264 = vmatprep.subr.mxu0 %v4215_v8  ;;  %3304 = vmatpush3.msra.mxu1 %v2059_v19  ;;  %v2101_v57 = vand.u32 4294901760, %v2100_v50  ;;  %v2582_v19 = vld [vmem:[%s4519_s6] ss:$0 sm:$0xff] }
 0x236   :  { %3265 = vmatpush3.msra.mxu0 %v4215_v8  ;;  %3305 = vmatprep.subr.mxu1 %v2066_v36 }
 0x237   :  { %3266 = vmatprep.subr.mxu0 %v4225_v1  ;;  %3306 = vmatpush3.msra.mxu1 %v2066_v36 }
 0x238   :  { %3267 = vmatpush3.msra.mxu0 %v4225_v1  ;;  %3307 = vmatprep.subr.mxu1 %v2073_v44 }
 0x239   :  { %3268 = vmatprep.subr.mxu0 %v4238_v27  ;;  %3308 = vmatpush3.msra.mxu1 %v2073_v44 }
 0x23a   :  { %3269 = vmatpush3.msra.mxu0 %v4238_v27  ;;  %3309 = vmatprep.subr.mxu1 %v2080_v2 }
 0x23b   :  { %3270 = vmatprep.subr.mxu0 %v4253_v29  ;;  %3310 = vmatpush3.msra.mxu1 %v2080_v2 }
 0x23c   :  { %3271 = vmatpush3.msra.mxu0 %v4253_v29  ;;  %3311 = vmatprep.subr.mxu1 %v2087_v32 }
 0x23d   :  { %3272 = vmatprep.subr.mxu0 %v4269_v45  ;;  %3312 = vmatpush3.msra.mxu1 %v2087_v32 }
 0x23e   :  { %3273 = vmatpush3.msra.mxu0 %v4269_v45  ;;  %3313 = vmatprep.subr.mxu1 %v2094_v49 }
 0x23f   :  { %3274 = vmatprep.subr.mxu0 %v4280_v6  ;;  %3314 = vmatpush3.msra.mxu1 %v2094_v49 }
 0x240   :  { %3275 = vmatpush3.msra.mxu0 %v4280_v6  ;;  %3315 = vmatprep.subr.mxu1 %v2101_v57 }
 0x241   :  { %3276 = vmatprep.subr.mxu0 %v4294_v18  ;;  %3316 = vmatpush3.msra.mxu1 %v2101_v57 }
 0x242   :  { %3277 = vmatpush3.msra.mxu0 %v4294_v18  ;;  %3355 = vmatprep.subr.mxu1 %v4112_v60 }
 0x243   :  { %3278 = vmatprep.subr.mxu0 %v4310_v23 }
 0x244   :  { %3279 = vmatpush3.msra.mxu0 %v4310_v23 }
 0x245   :  { %3280 = vmatprep.subr.mxu0 %v4327_v43 }
 0x246   :  { %3281 = vmatpush3.msra.mxu0 %v4327_v43 }
 0x247   :  { %3320 = vmatprep.subr.mxu0 %v4139_v21 }
 0x29d   :  { %v3109_v20 = vpop.f32.mrf.mxu1 }
 0x29f   :  { %v1429_v59 = vpop.f32.mrf.mxu1 }
 0x2a5   :  { %v3074_v16 = vpop.f32.mrf.mxu0 }
 0x2a6   :  { %v1279_v36 = vadd.f32 %v3074_v16, %v2582_v19 }
 0x2a7   :  { %v1268_v35 = vpop.f32.mrf.mxu0 }
 0x2a8   :  { %v1269_v47 = vadd.f32 %v2582_v19, %v1268_v35  ;;  %v1436_v44 = vadd.f32 %v3109_v20, %v1279_v36 }
 0x2aa   :  { %v1430_v33 = vadd.f32 %v1429_v59, %v1269_v47 }
 0x2be   :  { %v3179_v2 = vpop.f32.mrf.mxu1 }
 0x2c0   :  { %v1635_v50 = vpop.f32.mrf.mxu1 }
 0x2c6   :  { %v3144_v40 = vpop.f32.mrf.mxu0 }
 0x2c7   :  { %v1547_v32 = vadd.f32 %v3144_v40, %v1436_v44 }
 0x2c8   :  { %v1539_v11 = vpop.f32.mrf.mxu0 }
 0x2c9   :  { %v1540_v49 = vadd.f32 %v1539_v11, %v1430_v33  ;;  %v1644_v57 = vadd.f32 %v3179_v2, %v1547_v32 }
 0x2cb   :  { %v1636_v52 = vadd.f32 %v1635_v50, %v1540_v49 }
 0x2e0   :  { %v3249_v37 = vpop.f32.mrf.mxu1 }
 0x2e2   :  { %v1855_v5 = vpop.f32.mrf.mxu1 }
 0x2e7   :  { %v3214_v41 = vpop.f32.mrf.mxu0 }
 0x2e8   :  { %v1769_v0 = vadd.f32 %v3214_v41, %v1644_v57 }
 0x2e9   :  { %v1762_v31 = vpop.f32.mrf.mxu0 }
 0x2ea   :  { %v1862_v61 = vadd.f32 %v3249_v37, %v1769_v0  ;;  %v1763_v38 = vadd.f32 %v1762_v31, %v1636_v52 }
 0x2ec   :  { %v1866_v16 = vmax.f32 %v1862_v61, 0.0  ;;  %v1856_v12 = vadd.f32 %v1855_v5, %v1763_v38 }
 0x2ee   :  { %v4354_v19 = vand.u32 4294901760, %v1866_v16  ;;  %v1865_v20 = vmax.f32 %v1856_v12, 0.0 }
 0x2f0   :  { %v4357_v35 = vsub.f32 %v1866_v16, %v4354_v19  ;;  %v4359_v36 = vand.u32 4294901760, %v1865_v20 }
 0x2f2   :  { %v1983_v40 = vand.u32 4294901760, %v4357_v35  ;;  %v1972_v47 = vsub.f32 %v1865_v20, %v4359_v36  ;;  %3317 = vmatprep.mubr.f32.mxu1 %v4359_v36 }
 0x2f3   :  { %3318 = vmatmul.mubr.f32.vlgmr.msra.gmra.mxu1 %v4354_v19 }
 0x2f4   :  { %3356 = vmatpush3.msra.mxu1 %v4112_v60  ;;  %v1973_v61 = vand.u32 4294901760, %v1972_v47  ;;  %v1984_v12 = vsub.f32 %v4357_v35, %v1983_v40 }
 0x2f5   :  { %3357 = vmatprep.subr.mxu1 %v4123_v10 }
 0x2f6   :  { %3358 = vmatpush3.msra.mxu1 %v4123_v10  ;;  %3387 = vmatprep.mubr.f32.mxu1 %v1973_v61  ;;  %v1974_v5 = vsub.f32 %v1972_v47, %v1973_v61  ;;  %v1985_v31 = vand.u32 4294901760, %v1984_v12 }
 0x2f7   :  { %3359 = vmatprep.subr.mxu1 %v4125_v14 }
 0x2f8   :  { %3360 = vmatpush3.msra.mxu1 %v4125_v14  ;;  %v1975_v38 = vand.u32 4294901760, %v1974_v5 }
 0x2f9   :  { %3361 = vmatprep.subr.mxu1 %v4127_v15 }
 0x2fa   :  { %3362 = vmatpush3.msra.mxu1 %v4127_v15  ;;  %3282 = vmatprep.mubr.f32.mxu0 %v1975_v38 }
 0x2fb   :  { %3363 = vmatprep.subr.mxu1 %v4142_v25  ;;  %3283 = vmatmul.mubr.f32.vlgmr.msra.gmra.mxu0 %v1985_v31 }
 0x2fc   :  { %3321 = vmatpush3.msra.mxu0 %v4139_v21  ;;  %3364 = vmatpush3.msra.mxu1 %v4142_v25  ;;  %v4589_v21 = vld [vmem:[#allocation6_spill] sm:$0xff] }
 0x2fd   :  { %3322 = vmatprep.subr.mxu0 %v4149_v42  ;;  %3352 = vmatprep.mubr.f32.mxu0 %v1972_v47 }
 0x2fe   :  { %3365 = vmatprep.subr.mxu1 %v4144_v26  ;;  %3323 = vmatpush3.msra.mxu0 %v4149_v42  ;;  %v4593_v42 = vld [vmem:[#allocation10_spill] sm:$0xff] }
 0x2ff   :  { %3366 = vmatpush3.msra.mxu1 %v4144_v26  ;;  %3324 = vmatprep.subr.mxu0 %v4152_v46 }
 0x300   :  { %3367 = vmatprep.subr.mxu1 %v4146_v28  ;;  %3325 = vmatpush3.msra.mxu0 %v4152_v46 }
 0x301   :  { %3368 = vmatpush3.msra.mxu1 %v4146_v28  ;;  %3326 = vmatprep.subr.mxu0 %v4155_v54 }
 0x302   :  { %3369 = vmatprep.subr.mxu1 %v4215_v8  ;;  %3327 = vmatpush3.msra.mxu0 %v4155_v54  ;;  %v2583_v54 = vld [vmem:[%s4520_s8] ss:$0 sm:$0xff] }
 0x303   :  { %3370 = vmatpush3.msra.mxu1 %v4215_v8  ;;  %3328 = vmatprep.subr.mxu0 %v4162_v3 }
 0x304   :  { %3371 = vmatprep.subr.mxu1 %v4225_v1  ;;  %3329 = vmatpush3.msra.mxu0 %v4162_v3 }
 0x305   :  { %3372 = vmatpush3.msra.mxu1 %v4225_v1  ;;  %3330 = vmatprep.subr.mxu0 %v4166_v4 }
 0x306   :  { %3373 = vmatprep.subr.mxu1 %v4238_v27  ;;  %3331 = vmatpush3.msra.mxu0 %v4166_v4 }
 0x307   :  { %3374 = vmatpush3.msra.mxu1 %v4238_v27  ;;  %3332 = vmatprep.subr.mxu0 %v4185_v17 }
 0x308   :  { %3375 = vmatprep.subr.mxu1 %v4253_v29  ;;  %3333 = vmatpush3.msra.mxu0 %v4185_v17 }
 0x309   :  { %3376 = vmatpush3.msra.mxu1 %v4253_v29  ;;  %3334 = vmatprep.subr.mxu0 %v4223_v51 }
 0x30a   :  { %3377 = vmatprep.subr.mxu1 %v4269_v45  ;;  %3335 = vmatpush3.msra.mxu0 %v4223_v51 }
 0x30b   :  { %3378 = vmatpush3.msra.mxu1 %v4269_v45  ;;  %3336 = vmatprep.subr.mxu0 %v4236_v22 }
 0x30c   :  { %3379 = vmatprep.subr.mxu1 %v4280_v6  ;;  %3337 = vmatpush3.msra.mxu0 %v4236_v22 }
 0x30d   :  { %3380 = vmatpush3.msra.mxu1 %v4280_v6  ;;  %3338 = vmatprep.subr.mxu0 %v4251_v55 }
 0x30e   :  { %3381 = vmatprep.subr.mxu1 %v4294_v18  ;;  %3339 = vmatpush3.msra.mxu0 %v4251_v55 }
 0x30f   :  { %3382 = vmatpush3.msra.mxu1 %v4294_v18  ;;  %3340 = vmatprep.subr.mxu0 %v4266_v39 }
 0x310   :  { %3383 = vmatprep.subr.mxu1 %v4310_v23  ;;  %3341 = vmatpush3.msra.mxu0 %v4266_v39 }
 0x311   :  { %3384 = vmatpush3.msra.mxu1 %v4310_v23  ;;  %3342 = vmatprep.subr.mxu0 %v4283_v9 }
 0x312   :  { %3385 = vmatprep.subr.mxu1 %v4327_v43  ;;  %3343 = vmatpush3.msra.mxu0 %v4283_v9 }
 0x313   :  { %3386 = vmatpush3.msra.mxu1 %v4327_v43  ;;  %3344 = vmatprep.subr.mxu0 %v4292_v62 }
 0x314   :  { %3388 = vmatmul.mubr.f32.vlgmr.msra.gmra.mxu1 %v1983_v40  ;;  %3425 = vmatprep.subr.mxu1 %v4112_v60 }
 0x315   :  { %3345 = vmatpush3.msra.mxu0 %v4292_v62  ;;  %3426 = vmatpush3.msra.mxu1 %v4112_v60  ;;  %v4585_v60 = vld [vmem:[#allocation2_spill] sm:$0xff] }
 0x316   :  { %3457 = vmatprep.mubr.f32.mxu1 %v4359_v36  ;;  %3346 = vmatprep.subr.mxu0 %v4308_v63 }
 0x317   :  { %3427 = vmatprep.subr.mxu1 %v4123_v10  ;;  %3347 = vmatpush3.msra.mxu0 %v4308_v63 }
 0x318   :  { %3428 = vmatpush3.msra.mxu1 %v4123_v10  ;;  %3348 = vmatprep.subr.mxu0 %v4325_v7  ;;  %v4586_v10 = vld [vmem:[#allocation3_spill] sm:$0xff] }
 0x319   :  { %3429 = vmatprep.subr.mxu1 %v4125_v14  ;;  %3349 = vmatpush3.msra.mxu0 %v4325_v7 }
 0x31a   :  { %3430 = vmatpush3.msra.mxu1 %v4125_v14  ;;  %3350 = vmatprep.subr.mxu0 %v4337_v53  ;;  %v4587_v14 = vld [vmem:[#allocation4_spill] sm:$0xff] }
 0x31b   :  { %3431 = vmatprep.subr.mxu1 %v4127_v15  ;;  %3351 = vmatpush3.msra.mxu0 %v4337_v53 }
 0x31c   :  { %3432 = vmatpush3.msra.mxu1 %v4127_v15  ;;  %3353 = vmatmul.mubr.f32.vlgmr.msra.gmra.mxu0 %v4357_v35  ;;  %v4588_v15 = vld [vmem:[#allocation5_spill] sm:$0xff] }
 0x31d   :  { %3390 = vmatprep.subr.mxu0 %v4159_v58  ;;  %3433 = vmatprep.subr.mxu1 %v4142_v25 }
 0x31e   :  { %3391 = vmatpush3.msra.mxu0 %v4159_v58  ;;  %3422 = vmatprep.mubr.f32.mxu0 %v4359_v36 }
 0x31f   :  { %3434 = vmatpush3.msra.mxu1 %v4142_v25  ;;  %3392 = vmatprep.subr.mxu0 %v4169_v30  ;;  %v4590_v25 = vld [vmem:[#allocation7_spill] sm:$0xff] }
 0x320   :  { %3435 = vmatprep.subr.mxu1 %v4144_v26  ;;  %3393 = vmatpush3.msra.mxu0 %v4169_v30 }
 0x321   :  { %3436 = vmatpush3.msra.mxu1 %v4144_v26  ;;  %3394 = vmatprep.subr.mxu0 %v4172_v34  ;;  %v4591_v26 = vld [vmem:[#allocation8_spill] sm:$0xff] }
 0x322   :  { %3437 = vmatprep.subr.mxu1 %v4146_v28  ;;  %3395 = vmatpush3.msra.mxu0 %v4172_v34 }
 0x323   :  { %3438 = vmatpush3.msra.mxu1 %v4146_v28  ;;  %3396 = vmatprep.subr.mxu0 %v4175_v56  ;;  %v4592_v28 = vld [vmem:[#allocation9_spill] sm:$0xff] }
 0x324   :  { %3439 = vmatprep.subr.mxu1 %v4215_v8  ;;  %3397 = vmatpush3.msra.mxu0 %v4175_v56 }
 0x325   :  { %3440 = vmatpush3.msra.mxu1 %v4215_v8  ;;  %3398 = vmatprep.subr.mxu0 %v4181_v13 }
 0x326   :  { %3441 = vmatprep.subr.mxu1 %v4225_v1  ;;  %3399 = vmatpush3.msra.mxu0 %v4181_v13 }
 0x327   :  { %3442 = vmatpush3.msra.mxu1 %v4225_v1  ;;  %3400 = vmatprep.subr.mxu0 %v4195_v48 }
 0x328   :  { %3443 = vmatprep.subr.mxu1 %v4238_v27  ;;  %3401 = vmatpush3.msra.mxu0 %v4195_v48 }
 0x329   :  { %3444 = vmatpush3.msra.mxu1 %v4238_v27  ;;  %3402 = vmatprep.subr.mxu0 %v4202_v24 }
 0x32a   :  { %3445 = vmatprep.subr.mxu1 %v4253_v29  ;;  %3403 = vmatpush3.msra.mxu0 %v4202_v24 }
 0x32b   :  { %3446 = vmatpush3.msra.mxu1 %v4253_v29  ;;  %3404 = vmatprep.subr.mxu0 %v4585_v60 }
 0x32c   :  { %3447 = vmatprep.subr.mxu1 %v4269_v45  ;;  %3405 = vmatpush3.msra.mxu0 %v4585_v60 }
 0x32d   :  { %3448 = vmatpush3.msra.mxu1 %v4269_v45  ;;  %3406 = vmatprep.subr.mxu0 %v4586_v10 }
 0x32e   :  { %3449 = vmatprep.subr.mxu1 %v4280_v6  ;;  %3407 = vmatpush3.msra.mxu0 %v4586_v10 }
 0x32f   :  { %3450 = vmatpush3.msra.mxu1 %v4280_v6  ;;  %3408 = vmatprep.subr.mxu0 %v4587_v14 }
 0x330   :  { %3451 = vmatprep.subr.mxu1 %v4294_v18  ;;  %3409 = vmatpush3.msra.mxu0 %v4587_v14 }
 0x331   :  { %3452 = vmatpush3.msra.mxu1 %v4294_v18  ;;  %3410 = vmatprep.subr.mxu0 %v4588_v15 }
 0x332   :  { %3453 = vmatprep.subr.mxu1 %v4310_v23  ;;  %3411 = vmatpush3.msra.mxu0 %v4588_v15 }
 0x333   :  { %3454 = vmatpush3.msra.mxu1 %v4310_v23  ;;  %3412 = vmatprep.subr.mxu0 %v4589_v21 }
 0x334   :  { %3455 = vmatprep.subr.mxu1 %v4327_v43  ;;  %3413 = vmatpush3.msra.mxu0 %v4589_v21 }
 0x335   :  { %3456 = vmatpush3.msra.mxu1 %v4327_v43  ;;  %3414 = vmatprep.subr.mxu0 %v4590_v25 }
 0x336   :  { %3458 = vmatmul.mubr.f32.vlgmr.msra.gmra.mxu1 %v4354_v19  ;;  %3415 = vmatpush3.msra.mxu0 %v4590_v25 }
 0x337   :  { %3416 = vmatprep.subr.mxu0 %v4591_v26 }
 0x338   :  { %3417 = vmatpush3.msra.mxu0 %v4591_v26 }
 0x339   :  { %3418 = vmatprep.subr.mxu0 %v4592_v28 }
 0x33a   :  { %3419 = vmatpush3.msra.mxu0 %v4592_v28 }
 0x33b   :  { %3420 = vmatprep.subr.mxu0 %v4593_v42 }
 0x33c   :  { %3421 = vmatpush3.msra.mxu0 %v4593_v42 }
 0x33d   :  { %3423 = vmatmul.mubr.f32.vlgmr.msra.gmra.mxu0 %v4354_v19 }
 0x3b3   :  { %v3319_v58 = vpop.f32.mrf.mxu1 }
 0x3b5   :  { %v2138_v56 = vpop.f32.mrf.mxu1 }
 0x3bb   :  { %v3284_v46 = vpop.f32.mrf.mxu0 }
 0x3bc   :  { %v1988_v4 = vadd.f32 %v3284_v46, %v2583_v54 }
 0x3bd   :  { %v1977_v3 = vpop.f32.mrf.mxu0 }
 0x3be   :  { %v1978_v34 = vadd.f32 %v2583_v54, %v1977_v3  ;;  %v2145_v13 = vadd.f32 %v3319_v58, %v1988_v4 }
 0x3c0   :  { %v2139_v8 = vadd.f32 %v2138_v56, %v1978_v34 }
 0x3d4   :  { %v3389_v17 = vpop.f32.mrf.mxu1 }
 0x3d6   :  { %v2344_v1 = vpop.f32.mrf.mxu1 }
 0x3dc   :  { %v3354_v30 = vpop.f32.mrf.mxu0 }
 0x3dd   :  { %v2256_v24 = vadd.f32 %v3354_v30, %v2145_v13 }
 0x3de   :  { %v2248_v48 = vpop.f32.mrf.mxu0 }
 0x3df   :  { %v2249_v51 = vadd.f32 %v2248_v48, %v2139_v8  ;;  %v2353_v22 = vadd.f32 %v3389_v17, %v2256_v24 }
 0x3e1   :  { %v2345_v39 = vadd.f32 %v2344_v1, %v2249_v51 }
 0x3f6   :  { %v3459_v27 = vpop.f32.mrf.mxu1 }
 0x3f8   :  { %v2564_v62 = vpop.f32.mrf.mxu1 }
 0x3fd   :  { %v3424_v55 = vpop.f32.mrf.mxu0 }
 0x3fe   :  { %v2478_v29 = vadd.f32 %v3424_v55, %v2353_v22 }
 0x3ff   :  { %v2471_v45 = vpop.f32.mrf.mxu0 }
 0x400   :  { %v2571_v6 = vadd.f32 %v3459_v27, %v2478_v29  ;;  %v2472_v9 = vadd.f32 %v2471_v45, %v2345_v39 }
 0x402   :  { %2575 = vst.msk [vmem:[%s4521_s9 + $0x8] sm:$0xff] %vm569_vm1, %v2571_v6  ;;  %v2565_v18 = vadd.f32 %v2564_v62, %v2472_v9 }
 0x404   :  { %2574 = vst.msk [vmem:[%s4521_s9] sm:$0xff] %vm569_vm1, %v2565_v18 }

</bundles_post_ra>
